<compile_context>
chip_gen: v5e
topology: v5e:2x2
jax: 0.10.0
libtpu: 0.0.40
codegen_flags: <defaults>
</compile_context>

<pallas_src>
import math
import functools

import jax
import jax.numpy as jnp
from jax.experimental import pallas as pl
from jax.experimental.pallas import tpu as pltpu

# ---------------- model hyper-params (small, consistent with module) -------
SEQ = 8          # L
BATCH = 2        # N
WIDTH = 32       # D  (transformer.width)
HEADS = 4        # n_head (D // HEADS = 8)
LAYERS = 2       # transformer.layers
LN_EPS = 1e-5


# ---------------------------- Pallas kernel --------------------------------
def _layernorm_fused(v, g, b):
    """LayerNorm with fused stats: var = E[x^2] - mu^2 (one pass over v)."""
    mu = jnp.mean(v, axis=-1, keepdims=True)
    m2 = jnp.mean(v * v, axis=-1, keepdims=True)
    var = m2 - mu * mu
    return (v - mu) * jax.lax.rsqrt(var + LN_EPS) * g + b


def fused_stack_kernel(num_heads, nb,
                       x_ref,
                       ln1_g, ln1_b, wqkv, bqkv, wo, bo,
                       ln2_g, ln2_b, wfc, bfc, wproj, bproj,
                       o_ref,
                       x_carry):
    """Grid = (batch_group, layer).  One group of Nb batch elements ([Nb*L, D]
    rows) per step; the f32 residual stream lives in `x_carry` (VMEM) across
    the (inner, 'arbitrary') layer axis."""
    layer = pl.program_id(1)
    n_layers = pl.num_programs(1)

    R, D = x_carry.shape                                   # R = Nb * L
    L = R // nb
    Dh = D // num_heads

    # Residual stream loaded from HBM once per batch group.
    @pl.when(layer == 0)
    def _():
        x_carry[...] = x_ref[...].reshape(R, D)

    x = x_carry[...]                                       # [R, D] f32

    # ---- x = x + MultiheadAttention(LN1(x)) --------------------------------
    h = _layernorm_fused(x, ln1_g[0], ln1_b[0])            # [R, D] f32
    # wqkv pre-transposed [D, 3D] bf16; 1/sqrt(Dh) folded into the q columns.
    qkv = jnp.dot(h.astype(jnp.bfloat16), wqkv[0],
                  preferred_element_type=jnp.float32) + bqkv[0]     # [R, 3D]

    heads_out = []
    for hd in range(num_heads):                            # static unroll
        q_h = qkv[:, hd * Dh:(hd + 1) * Dh].reshape(nb, L, Dh).astype(jnp.bfloat16)
        k_h = qkv[:, D + hd * Dh:D + (hd + 1) * Dh].reshape(nb, L, Dh).astype(jnp.bfloat16)
        v_h = qkv[:, 2 * D + hd * Dh:2 * D + (hd + 1) * Dh].reshape(nb, L, Dh).astype(jnp.bfloat16)
        # scores: 'bld,bmd->blm' (batched over Nb, no explicit transpose of k)
        s = jax.lax.dot_general(q_h, k_h, (((2,), (2,)), ((0,), (0,))),
                                preferred_element_type=jnp.float32)  # [nb,L,L]
        s = s - jnp.max(s, axis=-1, keepdims=True)
        p = jnp.exp(s)
        p = p * pl.reciprocal(jnp.sum(p, axis=-1, keepdims=True), approx=True)
        # 'blm,bmd->bld'
        o_h = jax.lax.dot_general(p.astype(jnp.bfloat16), v_h,
                                  (((2,), (1,)), ((0,), (0,))),
                                  preferred_element_type=jnp.float32)  # [nb,L,Dh]
        heads_out.append(o_h)
    attn = jnp.concatenate(heads_out, axis=-1).reshape(R, D)          # [R, D]
    attn = jnp.dot(attn.astype(jnp.bfloat16), wo[0],
                   preferred_element_type=jnp.float32) + bo[0]
    x1 = x + attn

    # ---- x = x + MLP(LN2(x)) : Linear -> QuickGELU -> Linear ---------------
    h2 = _layernorm_fused(x1, ln2_g[0], ln2_b[0])
    h2 = jnp.dot(h2.astype(jnp.bfloat16), wfc[0],
                 preferred_element_type=jnp.float32) + bfc[0]
    h2 = h2 * jax.nn.sigmoid(1.702 * h2)                   # QuickGELU (CLIP)
    h2 = jnp.dot(h2.astype(jnp.bfloat16), wproj[0],
                 preferred_element_type=jnp.float32) + bproj[0]
    x2 = x1 + h2

    x_carry[...] = x2                                      # carry to next layer

    @pl.when(layer == n_layers - 1)
    def _():
        o_ref[...] = x2.reshape(nb, L, D).astype(o_ref.dtype)


def _pick_nb(n, seq, rows_target=256):
    """Pick Nb so Nb*L approaches the MXU M-dim (256 rows on v6e/v7x, 128 on
    v5e) while, when that is still possible, keeping >=2 batch grid points so
    both v7x TensorCores get work."""
    nb = max(1, min(n, max(1, rows_target // max(seq, 1))))
    while n % nb:
        nb -= 1
    if n // nb < 2 and n >= 2 and (n // 2) * seq >= 128:
        nb = n // 2
        while n % nb:
            nb -= 1
    return nb


def fused_stack(x_nld, prep, num_heads, nb=None):
    """Run all layers in `prep` (stacked along axis 0). x_nld: [N, L, D] f32."""
    N, L, D = x_nld.shape
    n_layers = prep["wqkv"].shape[0]
    if nb is None:
        nb = _pick_nb(N, L)

    weights = (prep["ln1_g"], prep["ln1_b"], prep["wqkv"], prep["bqkv"],
               prep["wo"], prep["bo"], prep["ln2_g"], prep["ln2_b"],
               prep["wfc"], prep["bfc"], prep["wproj"], prep["bproj"])

    def wspec(arr):
        # arr: [LAYERS, a, b]; stream one layer's slab per layer grid step.
        return pl.BlockSpec((1,) + arr.shape[1:], lambda n, l: (l, 0, 0))

    return pl.pallas_call(
        functools.partial(fused_stack_kernel, num_heads, nb),
        out_shape=jax.ShapeDtypeStruct((N, L, D), jnp.float32),
        grid_spec=pltpu.PrefetchScalarGridSpec(
            num_scalar_prefetch=0,
            grid=(N // nb, n_layers),
            in_specs=[pl.BlockSpec((nb, L, D), lambda n, l: (n, 0, 0))]
                     + [wspec(w) for w in weights],
            out_specs=pl.BlockSpec((nb, L, D), lambda n, l: (n, 0, 0)),
            scratch_shapes=[pltpu.VMEM((nb * L, D), jnp.float32)],
        ),
        compiler_params=pltpu.CompilerParams(
            dimension_semantics=("parallel", "arbitrary"),
            vmem_limit_bytes=48 * 1024 * 1024),
    )(x_nld, *weights)


# ------------------------ TransformerWrapper.forward -----------------------
def transformer_wrapper_forward(x_lnd, prep, start_layer=None, end_layer=None,
                                num_heads=HEADS):
    """Semantics of TransformerWrapper.forward.  x_lnd: [L, N, D]."""
    n_layers = prep["wqkv"].shape[0]
    if start_layer is None:
        start_layer = 0
    if end_layer is None:
        end_layer = n_layers - 1
    if end_layer < start_layer:
        return x_lnd
    sub = {k: v[start_layer:end_layer + 1] for k, v in prep.items()}
    xb = jnp.transpose(x_lnd, (1, 0, 2))          # [N, L, D] (glue only)
    xb = fused_stack(xb, sub, num_heads)
    return jnp.transpose(xb, (1, 0, 2))           # [L, N, D]


# ----------------------- deterministic parameter init ----------------------
def init_params(key, width, layers):
    """Parameters in the native PyTorch layout (weight @ x.T convention)."""
    params = []
    for li in range(layers):
        k = jax.random.fold_in(key, li)
        ks = jax.random.split(k, 6)
        std = 0.02
        p = {
            "ln1_g": jnp.ones((1, width), jnp.float32),
            "ln1_b": jnp.zeros((1, width), jnp.float32),
            "wqkv": std * jax.random.normal(ks[0], (3 * width, width), jnp.float32),
            "bqkv": std * jax.random.normal(ks[1], (1, 3 * width), jnp.float32),
            "wo": std * jax.random.normal(ks[2], (width, width), jnp.float32),
            "bo": jnp.zeros((1, width), jnp.float32),
            "ln2_g": jnp.ones((1, width), jnp.float32),
            "ln2_b": jnp.zeros((1, width), jnp.float32),
            "wfc": std * jax.random.normal(ks[3], (4 * width, width), jnp.float32),
            "bfc": std * jax.random.normal(ks[4], (1, 4 * width), jnp.float32),
            "wproj": std * jax.random.normal(ks[5], (width, 4 * width), jnp.float32),
            "bproj": jnp.zeros((1, width), jnp.float32),
        }
        params.append(p)
    return params


def prepare_params(params, num_heads):
    """One-time prep: pre-transpose matmul weights and cast them to bf16,
    fold 1/sqrt(Dh) into the q columns (+ bias), stack layers along axis 0.

    Shapes (LAYERS leading axis; last two dims are full-extent blocks):
      ln*_g/b, bo, bproj: [LAYERS,1,D] f32  bqkv: [LAYERS,1,3D] f32  bfc: [LAYERS,1,4D] f32
      wqkv: [LAYERS,D,3D] bf16  wo: [LAYERS,D,D] bf16
      wfc:  [LAYERS,D,4D] bf16  wproj: [LAYERS,4D,D] bf16
    """
    D = params[0]["wqkv"].shape[1]
    scale = 1.0 / math.sqrt(D // num_heads)
    keys = ["ln1_g", "ln1_b", "wqkv", "bqkv", "wo", "bo",
            "ln2_g", "ln2_b", "wfc", "bfc", "wproj", "bproj"]
    acc = {k: [] for k in keys}
    for p in params:
        wqkv_t = p["wqkv"].T                              # [D, 3D]
        wqkv_t = wqkv_t.at[:, :D].multiply(scale)         # fold attn scale into q
        bqkv = p["bqkv"][0].at[:D].multiply(scale)[None, :]
        acc["ln1_g"].append(p["ln1_g"]);  acc["ln1_b"].append(p["ln1_b"])
        acc["wqkv"].append(wqkv_t.astype(jnp.bfloat16));   acc["bqkv"].append(bqkv)
        acc["wo"].append(p["wo"].T.astype(jnp.bfloat16));  acc["bo"].append(p["bo"])
        acc["ln2_g"].append(p["ln2_g"]);  acc["ln2_b"].append(p["ln2_b"])
        acc["wfc"].append(p["wfc"].T.astype(jnp.bfloat16)); acc["bfc"].append(p["bfc"])
        acc["wproj"].append(p["wproj"].T.astype(jnp.bfloat16)); acc["bproj"].append(p["bproj"])
    return {k: jnp.stack(v, axis=0) for k, v in acc.items()}


# ----------------------------- pure-JAX reference ---------------------------
def _layernorm_ref(v, g, b):
    mu = jnp.mean(v, axis=-1, keepdims=True)
    var = jnp.mean((v - mu) ** 2, axis=-1, keepdims=True)
    return (v - mu) * jax.lax.rsqrt(var + LN_EPS) * g + b


def reference_forward(x_lnd, params, start_layer=None, end_layer=None,
                      num_heads=HEADS):
    n_layers = len(params)
    if start_layer is None:
        start_layer = 0
    if end_layer is None:
        end_layer = n_layers - 1
    if end_layer < start_layer:
        return x_lnd
    x = jnp.transpose(x_lnd, (1, 0, 2))           # [N, L, D]
    N, L, D = x.shape
    Dh = D // num_heads
    for li in range(start_layer, end_layer + 1):
        p = params[li]
        h = _layernorm_ref(x, p["ln1_g"][0], p["ln1_b"][0])
        qkv = jnp.einsum("nld,ed->nle", h, p["wqkv"]) + p["bqkv"][0]
        q, k, v = qkv[..., :D], qkv[..., D:2 * D], qkv[..., 2 * D:]
        q = q.reshape(N, L, num_heads, Dh)
        k = k.reshape(N, L, num_heads, Dh)
        v = v.reshape(N, L, num_heads, Dh)
        s = jnp.einsum("nlhd,nmhd->nhlm", q, k) / math.sqrt(Dh)
        w = jax.nn.softmax(s, axis=-1)
        a = jnp.einsum("nhlm,nmhd->nlhd", w, v).reshape(N, L, D)
        a = jnp.einsum("nld,ed->nle", a, p["wo"]) + p["bo"][0]
        x = x + a
        h2 = _layernorm_ref(x, p["ln2_g"][0], p["ln2_b"][0])
        h2 = jnp.einsum("nld,ed->nle", h2, p["wfc"]) + p["bfc"][0]
        h2 = h2 * jax.nn.sigmoid(1.702 * h2)
        h2 = jnp.einsum("nle,de->nld", h2, p["wproj"]) + p["bproj"][0]
        x = x + h2
    return jnp.transpose(x, (1, 0, 2))


# ----------------------------------- main -----------------------------------
if __name__ == "__main__":
    key = jax.random.PRNGKey(0)
    kx, kp = jax.random.split(key)
    x = jax.random.normal(kx, (SEQ, BATCH, WIDTH), jnp.float32)   # [L, N, D]
    params = init_params(kp, WIDTH, LAYERS)
    prep = prepare_params(params, HEADS)

    # Full stack (single fused pallas_call over all layers).
    out = transformer_wrapper_forward(x, prep)
    out = jax.block_until_ready(out)

    ref = reference_forward(x, params)
    assert out.shape == x.shape
    # bf16 MXU operands + approx reciprocal softmax -> relaxed tolerance.
    assert jnp.allclose(out, ref, rtol=1e-2, atol=1e-2), "mismatch vs reference"

    # start/end layer slicing semantics
    out_partial = jax.block_until_ready(
        transformer_wrapper_forward(x, prep, start_layer=1, end_layer=1))
    ref_partial = reference_forward(x, params, start_layer=1, end_layer=1)
    assert jnp.allclose(out_partial, ref_partial, rtol=1e-2, atol=1e-2)

    # end_layer < start_layer -> identity
    out_id = transformer_wrapper_forward(x, prep, start_layer=1, end_layer=0)
    assert jnp.allclose(out_id, x)

    print("KERNEL_OK")
</pallas_src>

<mosaic_0001>
module attributes {stable_mosaic.version = 11 : i64} {
  func.func @fused_stack_kernel(%arg0: i32, %arg1: i32, %arg2: memref<2x8x32xf32, #tpu.memory_space<vmem>>, %arg3: memref<1x1x32xf32, #tpu.memory_space<vmem>>, %arg4: memref<1x1x32xf32, #tpu.memory_space<vmem>>, %arg5: memref<1x32x96xbf16, #tpu.memory_space<vmem>>, %arg6: memref<1x1x96xf32, #tpu.memory_space<vmem>>, %arg7: memref<1x32x32xbf16, #tpu.memory_space<vmem>>, %arg8: memref<1x1x32xf32, #tpu.memory_space<vmem>>, %arg9: memref<1x1x32xf32, #tpu.memory_space<vmem>>, %arg10: memref<1x1x32xf32, #tpu.memory_space<vmem>>, %arg11: memref<1x32x128xbf16, #tpu.memory_space<vmem>>, %arg12: memref<1x1x128xf32, #tpu.memory_space<vmem>>, %arg13: memref<1x128x32xbf16, #tpu.memory_space<vmem>>, %arg14: memref<1x1x32xf32, #tpu.memory_space<vmem>>, %arg15: memref<2x8x32xf32, #tpu.memory_space<vmem>>, %arg16: memref<16x32xf32, #tpu.memory_space<vmem>>) attributes {dimension_semantics = [#tpu.dimension_semantics<parallel>, #tpu.dimension_semantics<arbitrary>], iteration_bounds = array<i64: 1, 2>, scalar_prefetch = 0 : i64, scratch_operands = 1 : i64, tpu.core_type = #tpu.core_type<tc>, window_params = [{transform_indices = @transform_0, window_bounds = array<i64: 2, 8, 32>}, {transform_indices = @transform_1, window_bounds = array<i64: 1, 1, 32>}, {transform_indices = @transform_2, window_bounds = array<i64: 1, 1, 32>}, {transform_indices = @transform_3, window_bounds = array<i64: 1, 32, 96>}, {transform_indices = @transform_4, window_bounds = array<i64: 1, 1, 96>}, {transform_indices = @transform_5, window_bounds = array<i64: 1, 32, 32>}, {transform_indices = @transform_6, window_bounds = array<i64: 1, 1, 32>}, {transform_indices = @transform_7, window_bounds = array<i64: 1, 1, 32>}, {transform_indices = @transform_8, window_bounds = array<i64: 1, 1, 32>}, {transform_indices = @transform_9, window_bounds = array<i64: 1, 32, 128>}, {transform_indices = @transform_10, window_bounds = array<i64: 1, 1, 128>}, {transform_indices = @transform_11, window_bounds = array<i64: 1, 128, 32>}, {transform_indices = @transform_12, window_bounds = array<i64: 1, 1, 32>}, {transform_indices = @transform_13, window_bounds = array<i64: 2, 8, 32>}]} {
    %c0_i32 = arith.constant 0 : i32
    %0 = arith.cmpi eq, %arg1, %c0_i32 : i32
    %1 = arith.extui %0 : i1 to i32
    %c0_i32_0 = arith.constant 0 : i32
    %2 = arith.cmpi ne, %1, %c0_i32_0 : i32
    scf.if %2 {
      %c0_72 = arith.constant 0 : index
      %c0_73 = arith.constant 0 : index
      %c0_74 = arith.constant 0 : index
      %192 = vector.load %arg2[%c0_72, %c0_73, %c0_74] : memref<2x8x32xf32, #tpu.memory_space<vmem>>, vector<2x8x32xf32>
      %193 = vector.shape_cast %192 : vector<2x8x32xf32> to vector<16x32xf32>
      %c0_75 = arith.constant 0 : index
      %c0_76 = arith.constant 0 : index
      %194 = vector.load %arg16[%c0_75, %c0_76] : memref<16x32xf32, #tpu.memory_space<vmem>>, vector<16x32xf32>
      tpu.vector_store %arg16[%c0_75, %c0_76], %193 {strides = array<i32>} : memref<16x32xf32, #tpu.memory_space<vmem>>, vector<16x32xf32>,
    } else {
    }
    %c0 = arith.constant 0 : index
    %c0_1 = arith.constant 0 : index
    %3 = vector.load %arg16[%c0, %c0_1] : memref<16x32xf32, #tpu.memory_space<vmem>>, vector<16x32xf32>
    %c0_2 = arith.constant 0 : index
    %c0_3 = arith.constant 0 : index
    %c0_4 = arith.constant 0 : index
    %4 = vector.load %arg3[%c0_2, %c0_3, %c0_4] : memref<1x1x32xf32, #tpu.memory_space<vmem>>, vector<1x1x32xf32>
    %5 = vector.shape_cast %4 : vector<1x1x32xf32> to vector<1x32xf32>
    %c0_5 = arith.constant 0 : index
    %c0_6 = arith.constant 0 : index
    %c0_7 = arith.constant 0 : index
    %6 = vector.load %arg4[%c0_5, %c0_6, %c0_7] : memref<1x1x32xf32, #tpu.memory_space<vmem>>, vector<1x1x32xf32>
    %7 = vector.shape_cast %6 : vector<1x1x32xf32> to vector<1x32xf32>
    %cst = arith.constant dense<0.000000e+00> : vector<16xf32>
    %8 = vector.multi_reduction <add>, %3, %cst [1] : vector<16x32xf32> to vector<16xf32>
    %9 = vector.shape_cast %8 : vector<16xf32> to vector<16x1xf32>
    %cst_8 = arith.constant 3.200000e+01 : f32
    %10 = vector.broadcast %cst_8 : f32 to vector<16x1xf32>
    %11 = arith.divf %9, %10 : vector<16x1xf32>
    %12 = arith.mulf %3, %3 : vector<16x32xf32>
    %cst_9 = arith.constant dense<0.000000e+00> : vector<16xf32>
    %13 = vector.multi_reduction <add>, %12, %cst_9 [1] : vector<16x32xf32> to vector<16xf32>
    %14 = vector.shape_cast %13 : vector<16xf32> to vector<16x1xf32>
    %cst_10 = arith.constant 3.200000e+01 : f32
    %15 = vector.broadcast %cst_10 : f32 to vector<16x1xf32>
    %16 = arith.divf %14, %15 : vector<16x1xf32>
    %17 = arith.mulf %11, %11 : vector<16x1xf32>
    %18 = arith.subf %16, %17 : vector<16x1xf32>
    %19 = vector.broadcast %11 : vector<16x1xf32> to vector<16x32xf32>
    %20 = arith.subf %3, %19 : vector<16x32xf32>
    %cst_11 = arith.constant 9.99999974E-6 : f32
    %21 = vector.broadcast %cst_11 : f32 to vector<16x1xf32>
    %22 = arith.addf %18, %21 : vector<16x1xf32>
    %23 = math.rsqrt %22 : vector<16x1xf32>
    %24 = vector.broadcast %23 : vector<16x1xf32> to vector<16x32xf32>
    %25 = arith.mulf %20, %24 : vector<16x32xf32>
    %26 = vector.broadcast %5 : vector<1x32xf32> to vector<16x32xf32>
    %27 = arith.mulf %25, %26 : vector<16x32xf32>
    %28 = vector.broadcast %7 : vector<1x32xf32> to vector<16x32xf32>
    %29 = arith.addf %27, %28 : vector<16x32xf32>
    %30 = arith.truncf %29 : vector<16x32xf32> to vector<16x32xbf16>
    %c0_12 = arith.constant 0 : index
    %c0_13 = arith.constant 0 : index
    %c0_14 = arith.constant 0 : index
    %31 = vector.load %arg5[%c0_12, %c0_13, %c0_14] : memref<1x32x96xbf16, #tpu.memory_space<vmem>>, vector<1x32x96xbf16>
    %32 = vector.shape_cast %31 : vector<1x32x96xbf16> to vector<32x96xbf16>
    %cst_15 = arith.constant dense<0.000000e+00> : vector<16x96xf32>
    %33 = tpu.matmul %30, %32, %cst_15 {dimension_numbers = #tpu.dot_dimension_numbers<[1], [0], [0], [1], [0, 0, 1, 1], [], []>} : vector<16x32xbf16>, vector<32x96xbf16>, vector<16x96xf32> -> vector<16x96xf32>
    %c0_16 = arith.constant 0 : index
    %c0_17 = arith.constant 0 : index
    %c0_18 = arith.constant 0 : index
    %34 = vector.load %arg6[%c0_16, %c0_17, %c0_18] : memref<1x1x96xf32, #tpu.memory_space<vmem>>, vector<1x1x96xf32>
    %35 = vector.shape_cast %34 : vector<1x1x96xf32> to vector<1x96xf32>
    %36 = vector.broadcast %35 : vector<1x96xf32> to vector<16x96xf32>
    %37 = arith.addf %33, %36 : vector<16x96xf32>
    %38 = vector.extract_strided_slice %37 {offsets = [0, 0], sizes = [16, 8], strides = [1, 1]} : vector<16x96xf32> to vector<16x8xf32>
    %39 = vector.shape_cast %38 : vector<16x8xf32> to vector<2x8x8xf32>
    %40 = arith.truncf %39 : vector<2x8x8xf32> to vector<2x8x8xbf16>
    %41 = vector.extract_strided_slice %37 {offsets = [0, 32], sizes = [16, 8], strides = [1, 1]} : vector<16x96xf32> to vector<16x8xf32>
    %42 = vector.shape_cast %41 : vector<16x8xf32> to vector<2x8x8xf32>
    %43 = arith.truncf %42 : vector<2x8x8xf32> to vector<2x8x8xbf16>
    %44 = vector.extract_strided_slice %37 {offsets = [0, 64], sizes = [16, 8], strides = [1, 1]} : vector<16x96xf32> to vector<16x8xf32>
    %45 = vector.shape_cast %44 : vector<16x8xf32> to vector<2x8x8xf32>
    %46 = arith.truncf %45 : vector<2x8x8xf32> to vector<2x8x8xbf16>
    %cst_19 = arith.constant dense<0.000000e+00> : vector<2x8x8xf32>
    %47 = tpu.matmul %40, %43, %cst_19 {dimension_numbers = #tpu.dot_dimension_numbers<[2], [2], [1], [1], [0, 0, 0, 1, 1, 1], [0], [0]>} : vector<2x8x8xbf16>, vector<2x8x8xbf16>, vector<2x8x8xf32> -> vector<2x8x8xf32>
    %cst_20 = arith.constant dense<0xFF800000> : vector<2x8xf32>
    %48 = vector.multi_reduction <maximumf>, %47, %cst_20 [2] : vector<2x8x8xf32> to vector<2x8xf32>
    %49 = vector.shape_cast %48 : vector<2x8xf32> to vector<2x8x1xf32>
    %50 = vector.broadcast %49 : vector<2x8x1xf32> to vector<2x8x8xf32>
    %51 = arith.subf %47, %50 : vector<2x8x8xf32>
    %52 = math.exp %51 : vector<2x8x8xf32>
    %cst_21 = arith.constant dense<0.000000e+00> : vector<2x8xf32>
    %53 = vector.multi_reduction <add>, %52, %cst_21 [2] : vector<2x8x8xf32> to vector<2x8xf32>
    %54 = vector.shape_cast %53 : vector<2x8xf32> to vector<2x8x1xf32>
    %55 = tpu.reciprocal %54 {approx = true} : vector<2x8x1xf32> -> vector<2x8x1xf32>
    %56 = vector.broadcast %55 : vector<2x8x1xf32> to vector<2x8x8xf32>
    %57 = arith.mulf %52, %56 : vector<2x8x8xf32>
    %58 = arith.truncf %57 : vector<2x8x8xf32> to vector<2x8x8xbf16>
    %cst_22 = arith.constant dense<0.000000e+00> : vector<2x8x8xf32>
    %59 = tpu.matmul %58, %46, %cst_22 {dimension_numbers = #tpu.dot_dimension_numbers<[2], [1], [1], [2], [0, 0, 0, 1, 1, 2], [0], [0]>} : vector<2x8x8xbf16>, vector<2x8x8xbf16>, vector<2x8x8xf32> -> vector<2x8x8xf32>
    %60 = vector.extract_strided_slice %37 {offsets = [0, 8], sizes = [16, 8], strides = [1, 1]} : vector<16x96xf32> to vector<16x8xf32>
    %61 = vector.shape_cast %60 : vector<16x8xf32> to vector<2x8x8xf32>
    %62 = arith.truncf %61 : vector<2x8x8xf32> to vector<2x8x8xbf16>
    %63 = vector.extract_strided_slice %37 {offsets = [0, 40], sizes = [16, 8], strides = [1, 1]} : vector<16x96xf32> to vector<16x8xf32>
    %64 = vector.shape_cast %63 : vector<16x8xf32> to vector<2x8x8xf32>
    %65 = arith.truncf %64 : vector<2x8x8xf32> to vector<2x8x8xbf16>
    %66 = vector.extract_strided_slice %37 {offsets = [0, 72], sizes = [16, 8], strides = [1, 1]} : vector<16x96xf32> to vector<16x8xf32>
    %67 = vector.shape_cast %66 : vector<16x8xf32> to vector<2x8x8xf32>
    %68 = arith.truncf %67 : vector<2x8x8xf32> to vector<2x8x8xbf16>
    %cst_23 = arith.constant dense<0.000000e+00> : vector<2x8x8xf32>
    %69 = tpu.matmul %62, %65, %cst_23 {dimension_numbers = #tpu.dot_dimension_numbers<[2], [2], [1], [1], [0, 0, 0, 1, 1, 1], [0], [0]>} : vector<2x8x8xbf16>, vector<2x8x8xbf16>, vector<2x8x8xf32> -> vector<2x8x8xf32>
    %cst_24 = arith.constant dense<0xFF800000> : vector<2x8xf32>
    %70 = vector.multi_reduction <maximumf>, %69, %cst_24 [2] : vector<2x8x8xf32> to vector<2x8xf32>
    %71 = vector.shape_cast %70 : vector<2x8xf32> to vector<2x8x1xf32>
    %72 = vector.broadcast %71 : vector<2x8x1xf32> to vector<2x8x8xf32>
    %73 = arith.subf %69, %72 : vector<2x8x8xf32>
    %74 = math.exp %73 : vector<2x8x8xf32>
    %cst_25 = arith.constant dense<0.000000e+00> : vector<2x8xf32>
    %75 = vector.multi_reduction <add>, %74, %cst_25 [2] : vector<2x8x8xf32> to vector<2x8xf32>
    %76 = vector.shape_cast %75 : vector<2x8xf32> to vector<2x8x1xf32>
    %77 = tpu.reciprocal %76 {approx = true} : vector<2x8x1xf32> -> vector<2x8x1xf32>
    %78 = vector.broadcast %77 : vector<2x8x1xf32> to vector<2x8x8xf32>
    %79 = arith.mulf %74, %78 : vector<2x8x8xf32>
    %80 = arith.truncf %79 : vector<2x8x8xf32> to vector<2x8x8xbf16>
    %cst_26 = arith.constant dense<0.000000e+00> : vector<2x8x8xf32>
    %81 = tpu.matmul %80, %68, %cst_26 {dimension_numbers = #tpu.dot_dimension_numbers<[2], [1], [1], [2], [0, 0, 0, 1, 1, 2], [0], [0]>} : vector<2x8x8xbf16>, vector<2x8x8xbf16>, vector<2x8x8xf32> -> vector<2x8x8xf32>
    %82 = vector.extract_strided_slice %37 {offsets = [0, 16], sizes = [16, 8], strides = [1, 1]} : vector<16x96xf32> to vector<16x8xf32>
    %83 = vector.shape_cast %82 : vector<16x8xf32> to vector<2x8x8xf32>
    %84 = arith.truncf %83 : vector<2x8x8xf32> to vector<2x8x8xbf16>
    %85 = vector.extract_strided_slice %37 {offsets = [0, 48], sizes = [16, 8], strides = [1, 1]} : vector<16x96xf32> to vector<16x8xf32>
    %86 = vector.shape_cast %85 : vector<16x8xf32> to vector<2x8x8xf32>
    %87 = arith.truncf %86 : vector<2x8x8xf32> to vector<2x8x8xbf16>
    %88 = vector.extract_strided_slice %37 {offsets = [0, 80], sizes = [16, 8], strides = [1, 1]} : vector<16x96xf32> to vector<16x8xf32>
    %89 = vector.shape_cast %88 : vector<16x8xf32> to vector<2x8x8xf32>
    %90 = arith.truncf %89 : vector<2x8x8xf32> to vector<2x8x8xbf16>
    %cst_27 = arith.constant dense<0.000000e+00> : vector<2x8x8xf32>
    %91 = tpu.matmul %84, %87, %cst_27 {dimension_numbers = #tpu.dot_dimension_numbers<[2], [2], [1], [1], [0, 0, 0, 1, 1, 1], [0], [0]>} : vector<2x8x8xbf16>, vector<2x8x8xbf16>, vector<2x8x8xf32> -> vector<2x8x8xf32>
    %cst_28 = arith.constant dense<0xFF800000> : vector<2x8xf32>
    %92 = vector.multi_reduction <maximumf>, %91, %cst_28 [2] : vector<2x8x8xf32> to vector<2x8xf32>
    %93 = vector.shape_cast %92 : vector<2x8xf32> to vector<2x8x1xf32>
    %94 = vector.broadcast %93 : vector<2x8x1xf32> to vector<2x8x8xf32>
    %95 = arith.subf %91, %94 : vector<2x8x8xf32>
    %96 = math.exp %95 : vector<2x8x8xf32>
    %cst_29 = arith.constant dense<0.000000e+00> : vector<2x8xf32>
    %97 = vector.multi_reduction <add>, %96, %cst_29 [2] : vector<2x8x8xf32> to vector<2x8xf32>
    %98 = vector.shape_cast %97 : vector<2x8xf32> to vector<2x8x1xf32>
    %99 = tpu.reciprocal %98 {approx = true} : vector<2x8x1xf32> -> vector<2x8x1xf32>
    %100 = vector.broadcast %99 : vector<2x8x1xf32> to vector<2x8x8xf32>
    %101 = arith.mulf %96, %100 : vector<2x8x8xf32>
    %102 = arith.truncf %101 : vector<2x8x8xf32> to vector<2x8x8xbf16>
    %cst_30 = arith.constant dense<0.000000e+00> : vector<2x8x8xf32>
    %103 = tpu.matmul %102, %90, %cst_30 {dimension_numbers = #tpu.dot_dimension_numbers<[2], [1], [1], [2], [0, 0, 0, 1, 1, 2], [0], [0]>} : vector<2x8x8xbf16>, vector<2x8x8xbf16>, vector<2x8x8xf32> -> vector<2x8x8xf32>
    %104 = vector.extract_strided_slice %37 {offsets = [0, 24], sizes = [16, 8], strides = [1, 1]} : vector<16x96xf32> to vector<16x8xf32>
    %105 = vector.shape_cast %104 : vector<16x8xf32> to vector<2x8x8xf32>
    %106 = arith.truncf %105 : vector<2x8x8xf32> to vector<2x8x8xbf16>
    %107 = vector.extract_strided_slice %37 {offsets = [0, 56], sizes = [16, 8], strides = [1, 1]} : vector<16x96xf32> to vector<16x8xf32>
    %108 = vector.shape_cast %107 : vector<16x8xf32> to vector<2x8x8xf32>
    %109 = arith.truncf %108 : vector<2x8x8xf32> to vector<2x8x8xbf16>
    %110 = vector.extract_strided_slice %37 {offsets = [0, 88], sizes = [16, 8], strides = [1, 1]} : vector<16x96xf32> to vector<16x8xf32>
    %111 = vector.shape_cast %110 : vector<16x8xf32> to vector<2x8x8xf32>
    %112 = arith.truncf %111 : vector<2x8x8xf32> to vector<2x8x8xbf16>
    %cst_31 = arith.constant dense<0.000000e+00> : vector<2x8x8xf32>
    %113 = tpu.matmul %106, %109, %cst_31 {dimension_numbers = #tpu.dot_dimension_numbers<[2], [2], [1], [1], [0, 0, 0, 1, 1, 1], [0], [0]>} : vector<2x8x8xbf16>, vector<2x8x8xbf16>, vector<2x8x8xf32> -> vector<2x8x8xf32>
    %cst_32 = arith.constant dense<0xFF800000> : vector<2x8xf32>
    %114 = vector.multi_reduction <maximumf>, %113, %cst_32 [2] : vector<2x8x8xf32> to vector<2x8xf32>
    %115 = vector.shape_cast %114 : vector<2x8xf32> to vector<2x8x1xf32>
    %116 = vector.broadcast %115 : vector<2x8x1xf32> to vector<2x8x8xf32>
    %117 = arith.subf %113, %116 : vector<2x8x8xf32>
    %118 = math.exp %117 : vector<2x8x8xf32>
    %cst_33 = arith.constant dense<0.000000e+00> : vector<2x8xf32>
    %119 = vector.multi_reduction <add>, %118, %cst_33 [2] : vector<2x8x8xf32> to vector<2x8xf32>
    %120 = vector.shape_cast %119 : vector<2x8xf32> to vector<2x8x1xf32>
    %121 = tpu.reciprocal %120 {approx = true} : vector<2x8x1xf32> -> vector<2x8x1xf32>
    %122 = vector.broadcast %121 : vector<2x8x1xf32> to vector<2x8x8xf32>
    %123 = arith.mulf %118, %122 : vector<2x8x8xf32>
    %124 = arith.truncf %123 : vector<2x8x8xf32> to vector<2x8x8xbf16>
    %cst_34 = arith.constant dense<0.000000e+00> : vector<2x8x8xf32>
    %125 = tpu.matmul %124, %112, %cst_34 {dimension_numbers = #tpu.dot_dimension_numbers<[2], [1], [1], [2], [0, 0, 0, 1, 1, 2], [0], [0]>} : vector<2x8x8xbf16>, vector<2x8x8xbf16>, vector<2x8x8xf32> -> vector<2x8x8xf32>
    %126 = tpu.concatenate %59, %81, %103, %125 in 2 : vector<2x8x8xf32>, vector<2x8x8xf32>, vector<2x8x8xf32>, vector<2x8x8xf32> -> vector<2x8x32xf32>
    %127 = vector.shape_cast %126 : vector<2x8x32xf32> to vector<16x32xf32>
    %128 = arith.truncf %127 : vector<16x32xf32> to vector<16x32xbf16>
    %c0_35 = arith.constant 0 : index
    %c0_36 = arith.constant 0 : index
    %c0_37 = arith.constant 0 : index
    %129 = vector.load %arg7[%c0_35, %c0_36, %c0_37] : memref<1x32x32xbf16, #tpu.memory_space<vmem>>, vector<1x32x32xbf16>
    %130 = vector.shape_cast %129 : vector<1x32x32xbf16> to vector<32x32xbf16>
    %cst_38 = arith.constant dense<0.000000e+00> : vector<16x32xf32>
    %131 = tpu.matmul %128, %130, %cst_38 {dimension_numbers = #tpu.dot_dimension_numbers<[1], [0], [0], [1], [0, 0, 1, 1], [], []>} : vector<16x32xbf16>, vector<32x32xbf16>, vector<16x32xf32> -> vector<16x32xf32>
    %c0_39 = arith.constant 0 : index
    %c0_40 = arith.constant 0 : index
    %c0_41 = arith.constant 0 : index
    %132 = vector.load %arg8[%c0_39, %c0_40, %c0_41] : memref<1x1x32xf32, #tpu.memory_space<vmem>>, vector<1x1x32xf32>
    %133 = vector.shape_cast %132 : vector<1x1x32xf32> to vector<1x32xf32>
    %134 = vector.broadcast %133 : vector<1x32xf32> to vector<16x32xf32>
    %135 = arith.addf %131, %134 : vector<16x32xf32>
    %136 = arith.addf %3, %135 : vector<16x32xf32>
    %c0_42 = arith.constant 0 : index
    %c0_43 = arith.constant 0 : index
    %c0_44 = arith.constant 0 : index
    %137 = vector.load %arg9[%c0_42, %c0_43, %c0_44] : memref<1x1x32xf32, #tpu.memory_space<vmem>>, vector<1x1x32xf32>
    %138 = vector.shape_cast %137 : vector<1x1x32xf32> to vector<1x32xf32>
    %c0_45 = arith.constant 0 : index
    %c0_46 = arith.constant 0 : index
    %c0_47 = arith.constant 0 : index
    %139 = vector.load %arg10[%c0_45, %c0_46, %c0_47] : memref<1x1x32xf32, #tpu.memory_space<vmem>>, vector<1x1x32xf32>
    %140 = vector.shape_cast %139 : vector<1x1x32xf32> to vector<1x32xf32>
    %cst_48 = arith.constant dense<0.000000e+00> : vector<16xf32>
    %141 = vector.multi_reduction <add>, %136, %cst_48 [1] : vector<16x32xf32> to vector<16xf32>
    %142 = vector.shape_cast %141 : vector<16xf32> to vector<16x1xf32>
    %cst_49 = arith.constant 3.200000e+01 : f32
    %143 = vector.broadcast %cst_49 : f32 to vector<16x1xf32>
    %144 = arith.divf %142, %143 : vector<16x1xf32>
    %145 = arith.mulf %136, %136 : vector<16x32xf32>
    %cst_50 = arith.constant dense<0.000000e+00> : vector<16xf32>
    %146 = vector.multi_reduction <add>, %145, %cst_50 [1] : vector<16x32xf32> to vector<16xf32>
    %147 = vector.shape_cast %146 : vector<16xf32> to vector<16x1xf32>
    %cst_51 = arith.constant 3.200000e+01 : f32
    %148 = vector.broadcast %cst_51 : f32 to vector<16x1xf32>
    %149 = arith.divf %147, %148 : vector<16x1xf32>
    %150 = arith.mulf %144, %144 : vector<16x1xf32>
    %151 = arith.subf %149, %150 : vector<16x1xf32>
    %152 = vector.broadcast %144 : vector<16x1xf32> to vector<16x32xf32>
    %153 = arith.subf %136, %152 : vector<16x32xf32>
    %cst_52 = arith.constant 9.99999974E-6 : f32
    %154 = vector.broadcast %cst_52 : f32 to vector<16x1xf32>
    %155 = arith.addf %151, %154 : vector<16x1xf32>
    %156 = math.rsqrt %155 : vector<16x1xf32>
    %157 = vector.broadcast %156 : vector<16x1xf32> to vector<16x32xf32>
    %158 = arith.mulf %153, %157 : vector<16x32xf32>
    %159 = vector.broadcast %138 : vector<1x32xf32> to vector<16x32xf32>
    %160 = arith.mulf %158, %159 : vector<16x32xf32>
    %161 = vector.broadcast %140 : vector<1x32xf32> to vector<16x32xf32>
    %162 = arith.addf %160, %161 : vector<16x32xf32>
    %163 = arith.truncf %162 : vector<16x32xf32> to vector<16x32xbf16>
    %c0_53 = arith.constant 0 : index
    %c0_54 = arith.constant 0 : index
    %c0_55 = arith.constant 0 : index
    %164 = vector.load %arg11[%c0_53, %c0_54, %c0_55] : memref<1x32x128xbf16, #tpu.memory_space<vmem>>, vector<1x32x128xbf16>
    %165 = vector.shape_cast %164 : vector<1x32x128xbf16> to vector<32x128xbf16>
    %cst_56 = arith.constant dense<0.000000e+00> : vector<16x128xf32>
    %166 = tpu.matmul %163, %165, %cst_56 {dimension_numbers = #tpu.dot_dimension_numbers<[1], [0], [0], [1], [0, 0, 1, 1], [], []>} : vector<16x32xbf16>, vector<32x128xbf16>, vector<16x128xf32> -> vector<16x128xf32>
    %c0_57 = arith.constant 0 : index
    %c0_58 = arith.constant 0 : index
    %c0_59 = arith.constant 0 : index
    %167 = vector.load %arg12[%c0_57, %c0_58, %c0_59] : memref<1x1x128xf32, #tpu.memory_space<vmem>>, vector<1x1x128xf32>
    %168 = vector.shape_cast %167 : vector<1x1x128xf32> to vector<1x128xf32>
    %169 = vector.broadcast %168 : vector<1x128xf32> to vector<16x128xf32>
    %170 = arith.addf %166, %169 : vector<16x128xf32>
    %cst_60 = arith.constant 1.702000e+00 : f32
    %171 = vector.broadcast %cst_60 : f32 to vector<16x128xf32>
    %172 = arith.mulf %171, %170 : vector<16x128xf32>
    %173 = arith.negf %172 : vector<16x128xf32>
    %174 = math.exp %173 : vector<16x128xf32>
    %cst_61 = arith.constant 1.000000e+00 : f32
    %175 = vector.broadcast %cst_61 : f32 to vector<16x128xf32>
    %176 = arith.addf %175, %174 : vector<16x128xf32>
    %177 = arith.divf %175, %176 : vector<16x128xf32>
    %178 = arith.mulf %170, %177 : vector<16x128xf32>
    %179 = arith.truncf %178 : vector<16x128xf32> to vector<16x128xbf16>
    %c0_62 = arith.constant 0 : index
    %c0_63 = arith.constant 0 : index
    %c0_64 = arith.constant 0 : index
    %180 = vector.load %arg13[%c0_62, %c0_63, %c0_64] : memref<1x128x32xbf16, #tpu.memory_space<vmem>>, vector<1x128x32xbf16>
    %181 = vector.shape_cast %180 : vector<1x128x32xbf16> to vector<128x32xbf16>
    %cst_65 = arith.constant dense<0.000000e+00> : vector<16x32xf32>
    %182 = tpu.matmul %179, %181, %cst_65 {dimension_numbers = #tpu.dot_dimension_numbers<[1], [0], [0], [1], [0, 0, 1, 1], [], []>} : vector<16x128xbf16>, vector<128x32xbf16>, vector<16x32xf32> -> vector<16x32xf32>
    %c0_66 = arith.constant 0 : index
    %c0_67 = arith.constant 0 : index
    %c0_68 = arith.constant 0 : index
    %183 = vector.load %arg14[%c0_66, %c0_67, %c0_68] : memref<1x1x32xf32, #tpu.memory_space<vmem>>, vector<1x1x32xf32>
    %184 = vector.shape_cast %183 : vector<1x1x32xf32> to vector<1x32xf32>
    %185 = vector.broadcast %184 : vector<1x32xf32> to vector<16x32xf32>
    %186 = arith.addf %182, %185 : vector<16x32xf32>
    %187 = arith.addf %136, %186 : vector<16x32xf32>
    %c0_69 = arith.constant 0 : index
    %c0_70 = arith.constant 0 : index
    %188 = vector.load %arg16[%c0_69, %c0_70] : memref<16x32xf32, #tpu.memory_space<vmem>>, vector<16x32xf32>
    tpu.vector_store %arg16[%c0_69, %c0_70], %187 {strides = array<i32>} : memref<16x32xf32, #tpu.memory_space<vmem>>, vector<16x32xf32>,
    %c1_i32 = arith.constant 1 : i32
    %189 = arith.cmpi eq, %arg1, %c1_i32 : i32
    %190 = arith.extui %189 : i1 to i32
    %c0_i32_71 = arith.constant 0 : i32
    %191 = arith.cmpi ne, %190, %c0_i32_71 : i32
    scf.if %191 {
      %192 = vector.shape_cast %187 : vector<16x32xf32> to vector<2x8x32xf32>
      %c0_72 = arith.constant 0 : index
      %c0_73 = arith.constant 0 : index
      %c0_74 = arith.constant 0 : index
      %193 = vector.load %arg15[%c0_72, %c0_73, %c0_74] : memref<2x8x32xf32, #tpu.memory_space<vmem>>, vector<2x8x32xf32>
      tpu.vector_store %arg15[%c0_72, %c0_73, %c0_74], %192 {strides = array<i32>} : memref<2x8x32xf32, #tpu.memory_space<vmem>>, vector<2x8x32xf32>,
    } else {
    }
    return
  }
  func.func @transform_0(%arg0: i32, %arg1: i32) -> (i32, i32, i32) {
    %c0_i32 = arith.constant 0 : i32
    %c0_i32_0 = arith.constant 0 : i32
    %c0_i32_1 = arith.constant 0 : i32
    return %arg0, %c0_i32, %c0_i32_0 : i32, i32, i32
  }
  func.func @transform_1(%arg0: i32, %arg1: i32) -> (i32, i32, i32) {
    %c0_i32 = arith.constant 0 : i32
    %c0_i32_0 = arith.constant 0 : i32
    %c0_i32_1 = arith.constant 0 : i32
    return %arg1, %c0_i32, %c0_i32_0 : i32, i32, i32
  }
  func.func @transform_2(%arg0: i32, %arg1: i32) -> (i32, i32, i32) {
    %c0_i32 = arith.constant 0 : i32
    %c0_i32_0 = arith.constant 0 : i32
    %c0_i32_1 = arith.constant 0 : i32
    return %arg1, %c0_i32, %c0_i32_0 : i32, i32, i32
  }
  func.func @transform_3(%arg0: i32, %arg1: i32) -> (i32, i32, i32) {
    %c0_i32 = arith.constant 0 : i32
    %c0_i32_0 = arith.constant 0 : i32
    %c0_i32_1 = arith.constant 0 : i32
    return %arg1, %c0_i32, %c0_i32_0 : i32, i32, i32
  }
  func.func @transform_4(%arg0: i32, %arg1: i32) -> (i32, i32, i32) {
    %c0_i32 = arith.constant 0 : i32
    %c0_i32_0 = arith.constant 0 : i32
    %c0_i32_1 = arith.constant 0 : i32
    return %arg1, %c0_i32, %c0_i32_0 : i32, i32, i32
  }
  func.func @transform_5(%arg0: i32, %arg1: i32) -> (i32, i32, i32) {
    %c0_i32 = arith.constant 0 : i32
    %c0_i32_0 = arith.constant 0 : i32
    %c0_i32_1 = arith.constant 0 : i32
    return %arg1, %c0_i32, %c0_i32_0 : i32, i32, i32
  }
  func.func @transform_6(%arg0: i32, %arg1: i32) -> (i32, i32, i32) {
    %c0_i32 = arith.constant 0 : i32
    %c0_i32_0 = arith.constant 0 : i32
    %c0_i32_1 = arith.constant 0 : i32
    return %arg1, %c0_i32, %c0_i32_0 : i32, i32, i32
  }
  func.func @transform_7(%arg0: i32, %arg1: i32) -> (i32, i32, i32) {
    %c0_i32 = arith.constant 0 : i32
    %c0_i32_0 = arith.constant 0 : i32
    %c0_i32_1 = arith.constant 0 : i32
    return %arg1, %c0_i32, %c0_i32_0 : i32, i32, i32
  }
  func.func @transform_8(%arg0: i32, %arg1: i32) -> (i32, i32, i32) {
    %c0_i32 = arith.constant 0 : i32
    %c0_i32_0 = arith.constant 0 : i32
    %c0_i32_1 = arith.constant 0 : i32
    return %arg1, %c0_i32, %c0_i32_0 : i32, i32, i32
  }
  func.func @transform_9(%arg0: i32, %arg1: i32) -> (i32, i32, i32) {
    %c0_i32 = arith.constant 0 : i32
    %c0_i32_0 = arith.constant 0 : i32
    %c0_i32_1 = arith.constant 0 : i32
    return %arg1, %c0_i32, %c0_i32_0 : i32, i32, i32
  }
  func.func @transform_10(%arg0: i32, %arg1: i32) -> (i32, i32, i32) {
    %c0_i32 = arith.constant 0 : i32
    %c0_i32_0 = arith.constant 0 : i32
    %c0_i32_1 = arith.constant 0 : i32
    return %arg1, %c0_i32, %c0_i32_0 : i32, i32, i32
  }
  func.func @transform_11(%arg0: i32, %arg1: i32) -> (i32, i32, i32) {
    %c0_i32 = arith.constant 0 : i32
    %c0_i32_0 = arith.constant 0 : i32
    %c0_i32_1 = arith.constant 0 : i32
    return %arg1, %c0_i32, %c0_i32_0 : i32, i32, i32
  }
  func.func @transform_12(%arg0: i32, %arg1: i32) -> (i32, i32, i32) {
    %c0_i32 = arith.constant 0 : i32
    %c0_i32_0 = arith.constant 0 : i32
    %c0_i32_1 = arith.constant 0 : i32
    return %arg1, %c0_i32, %c0_i32_0 : i32, i32, i32
  }
  func.func @transform_13(%arg0: i32, %arg1: i32) -> (i32, i32, i32) {
    %c0_i32 = arith.constant 0 : i32
    %c0_i32_0 = arith.constant 0 : i32
    %c0_i32_1 = arith.constant 0 : i32
    return %arg0, %c0_i32, %c0_i32_0 : i32, i32, i32
  }
}

</mosaic_0001>

<bundles_post_ra>
// kernel: tpu_custom_call.1
= control target key start
LH: loop header
LB: loop body
LE: loop exit
PB: predicated region body
PF: predicated region fallthrough
CT: control target
= control target key end

     0   :  { %s2400_s0 = inlined_call_operand.vmem [shape: f32[2,8,32], index: 0, kind: input, shape index: {}]   ;;  %s2401_s1 = inlined_call_operand.vmem [shape: f32[2,1,32], index: 1, kind: input, shape index: {}]   ;;  %s2402_s2 = inlined_call_operand.vmem [shape: f32[2,1,32], index: 2, kind: input, shape index: {}]   ;;  %s2403_s3 = inlined_call_operand.vmem [shape: bf16[2,32,96], index: 3, kind: input, shape index: {}]   ;;  %s2404_s4 = inlined_call_operand.vmem [shape: f32[2,1,96], index: 4, kind: input, shape index: {}]   ;;  %s2405_s5 = inlined_call_operand.vmem [shape: bf16[2,32,32], index: 5, kind: input, shape index: {}]   ;;  %s2406_s6 = inlined_call_operand.vmem [shape: f32[2,1,32], index: 6, kind: input, shape index: {}]   ;;  %s2407_s7 = inlined_call_operand.vmem [shape: f32[2,1,32], index: 7, kind: input, shape index: {}]   ;;  %s2408_s8 = inlined_call_operand.vmem [shape: f32[2,1,32], index: 8, kind: input, shape index: {}]   ;;  %s2409_s9 = inlined_call_operand.vmem [shape: bf16[2,32,128], index: 9, kind: input, shape index: {}]   ;;  %s2410_s10 = inlined_call_operand.vmem [shape: f32[2,1,128], index: 10, kind: input, shape index: {}]   ;;  %s2411_s11 = inlined_call_operand.vmem [shape: bf16[2,128,32], index: 11, kind: input, shape index: {}]   ;;  %s2412_s12 = inlined_call_operand.vmem [shape: f32[2,1,32], index: 12, kind: input, shape index: {}]   ;;  %s2413_s13 = inlined_call_operand.hbm [shape: f32[2,8,32], index: 13, kind: output, shape index: {}]  }
   0x1   :  { %2417 = sst [smem:[#allocation10_spill]] %s2403_s3 }
   0x2   :  { %2418 = sst [smem:[#allocation11_spill]] %s2405_s5 }
   0x3   :  { %2419 = sst [smem:[#allocation12_spill]] %s2413_s13 }
   0x4   :  { %18 = vsyncpa [#allocation4], 0  ;;  %s2080_s25 = smov 0   ;;  %s2082_s26 = smov 0  }
   0x5   :  { %s2084_s27 = smov 0  }
   0x6 LB: > { %2420 = sst [smem:[#allocation6_spill]] %s1987_s26  ;;  %s33_s29 = sadd.s32 1, %s1987_s26  ;;  %s1991_s27 = sphi %s2084_s27, %s24_s27   ;;  %s1987_s26 = sphi %s2082_s26, %s2436_s26   ;;  %s1983_s25 = sphi %s2080_s25, %s2435_s25  }
   0x7   : > { %2421 = sst [smem:[#allocation7_spill]] %s1991_s27  ;;  %p34_p0 = scmp.ge.s32.totalorder %s33_s29, 2 }
   0x8   : > { %p1707_p1 = scmp.ge.s32.totalorder %s1991_s27, 1  ;;  %p505_p2 = scmp.lt.s32.totalorder %s1991_s27, 3 }
   0x9   : > { %s2438_s29 = smov (%p34_p0, %s33_s29), 0 }
   0xa   : > { %2422 = sst [smem:[#allocation8_spill]] %s2438_s29  ;;  %p506_p3 = pnand %p1707_p1, %p505_p2 }
   0xc   : > { %509 = sbr.rel (%p506_p3) target bundleno = 1821 (0x71d), region = 72 }
  0x11   : > { %p594_p4 = scmp.lt.s32.totalorder %s1983_s25, 1  ;;  %s2423_s3 = sld [smem:[#allocation10_spill]] }
  0x12   : > { %s2424_s5 = sld [smem:[#allocation11_spill]]  ;;  %p1716_p5 = scmp.ne.s32.totalorder %s1983_s25, 0 }
  0x13   : > { %s2103_s30 = scalar_select %p594_p4, %s1983_s25, 1 }
  0x15   : > { %s1799_s20 = sshll.u32 %s2103_s30, 4  ;;  %s618_s27 = scalar_lea.vmem %s2407_s7, %s2103_s30 }
  0x16   : > { %s621_s23 = scalar_lea.vmem %s2408_s8, %s2103_s30  ;;  %s637_s21 = scalar_lea.vmem %s2412_s12, %s2103_s30 }
  0x17   : > { %s2121_s15 = scalar_lea.vmem %s2423_s3, %s1799_s20  ;;  %s2143_s3 = scalar_lea.vmem %s2409_s9, %s1799_s20 }
  0x18   : > { %s2126_s26 = scalar_lea.vmem %s2424_s5, %s1799_s20  ;;  %s629_s5 = scalar_lea.vmem %s2410_s10, %s2103_s30 }
  0x19   : > { %2425 = sst [smem:[#allocation9_spill]] %s2126_s26  ;;  %s1802_s26 = sshll.u32 %s2103_s30, 6 }
  0x1a   : > { %s2153_s17 = scalar_lea.vmem %s2411_s11, %s1802_s26  ;;  %643 = sbr.rel (%p1716_p5) target bundleno = 34 (0x22), region = 76 }
  0x1f   : > { %v644_v0 = vld [vmem:[%s2400_s0] sm:$0xff]  ;;  %vm646_vm0 = vcmask 261120   ;;  %v645_v1 = vld [vmem:[%s2400_s0 + $0x8] sm:$0xff] }
  0x20   : > { %647 = vst.msk [vmem:[#allocation2] sm:$0xff] %vm646_vm0, %v644_v0 }
  0x21   : > { %648 = vst.msk [vmem:[#allocation2 + $0x8] sm:$0xff] %vm646_vm0, %v645_v1 }
  0x22 PF: > { %vm653_vm1 = vcmask 261120   ;;  %v1993_v10 = vmov 32.0   ;;  %v1804_v20 = vld [vmem:[%s2121_s15 + $0x8] sm:$0xff]  ;;  %v1803_v23 = vld [vmem:[%s2121_s15] sm:$0xff]  ;;  %s2426_s28 = scalar_lea.vmem %s2401_s1, %s2103_s30  ;;  %s2427_s16 = scalar_lea.vmem %s2402_s2, %s2103_s30  ;;  %vm764_vm9 = vcmask 64512   ;;  %vm837_vm10 = vcmask 1043456  }
  0x23   : > { %1887 = vrcp.f32 %v1993_v10  ;;  %749 = vmatpush.bf16.msra.mxu0 %v1804_v20  ;;  %v1879_v47 = vld [vmem:[%s2426_s28] ss:$0 sm:$0xff]  ;;  %s2428_s22 = scalar_lea.vmem %s2404_s4, %s2103_s30  ;;  %s1994_s20 = smov 120   ;;  %vm1237_vm11 = vcmask 130048   ;;  %vm1240_vm12 = vcmask 195584  }
  0x24   : > { %v1880_v53 = vld [vmem:[%s2427_s16] ss:$0 sm:$0xff]  ;;  %s1995_s24 = smov 88   ;;  %s1996_s14 = smov 96  }
  0x25   : > { %v1881_v58 = vld [vmem:[%s2428_s22] ss:$0 sm:$0xff]  ;;  %s1997_s26 = smov 112   ;;  %s1998_s15 = smov 80  }
  0x26   : > { %s1999_s28 = smov 104   ;;  %s2000_s29 = smov 72  }
  0x27   : > { %v2166_v2 = vld [vmem:[#allocation2] sm:$0xff]  ;;  %750 = vmatpush.bf16.msra.mxu0 %v1803_v23  ;;  %s2001_s13 = smov 64   ;;  %s2002_s16 = smov 48  }
  0x28   : > { %v654_v3 = vsel %vm653_vm1, %v2166_v2, 0.0  ;;  %v669_v4 = vmul.f32 %v2166_v2, %v2166_v2  ;;  %v2172_v5 = vld [vmem:[#allocation2 + $0x8] sm:$0xff]  ;;  %s2003_s19 = smov 56   ;;  %s2004_s18 = smov 40  }
  0x29   : > { %655 = vadd.xlane.f32.xlu0 %v654_v3  ;;  %v670_v7 = vmul.f32 %v2172_v5, %v2172_v5  ;;  %v657_v8 = vsel %vm653_vm1, %v2172_v5, 0.0  ;;  %v1888_v11 = vpop.eup %1887  ;;  %s2429_s22 = sld [smem:[#allocation9_spill]]  ;;  %p1794_p6 = scmp.ne.s32.totalorder %s1983_s25, 1 }
  0x2a   : > { %v671_v6 = vsel %vm653_vm1, %v669_v4, 0.0  ;;  %v661_v12 = vmul.f32 32.0, %v1888_v11  ;;  %vm665_vm2 = vweird.f32 %v1888_v11 }
  0x2b   : > { %672 = vadd.xlane.f32.xlu1 %v671_v6  ;;  %v674_v9 = vsel %vm653_vm1, %v670_v7, 0.0 }
  0x2c   : > { %v662_v13 = vsub.f32 1.0, %v661_v12 }
  0x2e   : > { %v663_v14 = vmul.f32 %v1888_v11, %v662_v13 }
  0x30   : > { %v664_v15 = vadd.f32 %v1888_v11, %v663_v14 }
  0x31   : > { %658 = vadd.xlane.f32.xlu0 %v657_v8 }
  0x32   : > { %v2180_v16 = vsel %vm665_vm2, %v1888_v11, %v664_v15 }
  0x33   : > { %675 = vadd.xlane.f32.xlu1 %v674_v9 }
  0x9c   : > { %v656_v17 = vpop.xlane.xlu0 %655 }
  0x9d   : > { %v667_v18 = vmul.f32 %v2180_v16, %v656_v17 }
  0x9e   : > { %v673_v19 = vpop.xlane.xlu1 %672 }
  0x9f   : > { %v679_v21 = vmul.f32 %v667_v18, %v667_v18  ;;  %v677_v22 = vmul.f32 %v673_v19, %v2180_v16  ;;  %v683_v44 = vsub.f32 %v2166_v2, %v667_v18 }
  0xa1   : > { %v681_v24 = vsub.f32 %v677_v22, %v679_v21 }
  0xa3   : > { %v685_v25 = vadd.f32 1e-05, %v681_v24 }
  0xa4   : > { %v659_v26 = vpop.xlane.xlu0 %658 }
  0xa5   : > { %1889 = vrsqrt.f32 %v685_v25  ;;  %v668_v27 = vmul.f32 %v2180_v16, %v659_v26  ;;  %vm693_vm4 = vweird.f32 %v685_v25 }
  0xa6   : > { %v676_v28 = vpop.xlane.xlu1 %675 }
  0xa7   : > { %v680_v29 = vmul.f32 %v668_v27, %v668_v27  ;;  %v678_v30 = vmul.f32 %v676_v28, %v2180_v16  ;;  %v684_v49 = vsub.f32 %v2172_v5, %v668_v27 }
  0xa9   : > { %v682_v31 = vsub.f32 %v678_v30, %v680_v29 }
  0xab   : > { %v1890_v32 = vpop.eup %1889  ;;  %v686_v33 = vadd.f32 1e-05, %v682_v31 }
  0xac   : > { %v688_v34 = vmul.f32 %v1890_v32, %v685_v25  ;;  %vm694_vm3 = vweird.f32 %v1890_v32 }
  0xad   : > { %1891 = vrsqrt.f32 %v686_v33  ;;  %vm695_vm5 = vmor %vm693_vm4, %vm694_vm3  ;;  %vm703_vm7 = vweird.f32 %v686_v33 }
  0xae   : > { %v689_v35 = vmul.f32 %v1890_v32, %v688_v34 }
  0xb0   : > { %v690_v36 = vmul.f32 0.5, %v689_v35 }
  0xb2   : > { %v691_v37 = vsub.f32 1.5, %v690_v36 }
  0xb3   : > { %v1892_v38 = vpop.eup %1891 }
  0xb4   : > { %v692_v39 = vmul.f32 %v1890_v32, %v691_v37  ;;  %v698_v40 = vmul.f32 %v1892_v38, %v686_v33  ;;  %vm704_vm6 = vweird.f32 %v1892_v38 }
  0xb5   : > { %vm705_vm8 = vmor %vm703_vm7, %vm704_vm6 }
  0xb6   : > { %v699_v41 = vmul.f32 %v1892_v38, %v698_v40  ;;  %v696_v42 = vsel %vm695_vm5, %v1890_v32, %v692_v39 }
  0xb7   : > { %v707_v46 = vmul.f32 %v696_v42, %v683_v44 }
  0xb8   : > { %v700_v43 = vmul.f32 0.5, %v699_v41 }
  0xb9   : > { %v712_v52 = vmul.f32 %v1879_v47, %v707_v46 }
  0xba   : > { %v701_v45 = vsub.f32 1.5, %v700_v43 }
  0xbb   : > { %v717_v55 = vadd.f32 %v1880_v53, %v712_v52 }
  0xbc   : > { %v702_v48 = vmul.f32 %v1892_v38, %v701_v45 }
  0xbe   : > { %v706_v50 = vsel %vm705_vm8, %v1892_v38, %v702_v48 }
  0xbf   : > { %v708_v51 = vmul.f32 %v706_v50, %v684_v49 }
  0xc1   : > { %v713_v54 = vmul.f32 %v1879_v47, %v708_v51 }
  0xc3   : > { %v718_v56 = vadd.f32 %v1880_v53, %v713_v54 }
  0xc5   : > { %v719_v57 = vpack.c.bf16 %v718_v56, %v717_v55 }
  0xc7   : > { %1725 = vmatmul.msk.bf16.vlgmr.msra.gmra.mxu0 %vm653_vm1, %v719_v57 }
 0x144   : > { %v752_v59 = vpop.f32.mrf.mxu0 }
 0x145   : > { %v753_v60 = vadd.f32 %v1881_v58, %v752_v59 }
 0x147   : > { %v757_v61 = vpack.c.bf16 %v753_v60, %v753_v60 }
 0x149   : > { %v760_v62 = vunpack.c.l.b16 %v757_v61 }
 0x14b   : > { %v2206_v63 = vpack.c.b16 %v760_v62, %v760_v62 }
 0x14c   : > { %v754_v0 = vpop.f32.mrf.mxu0 }
 0x14d   : > { %v755_v1 = vadd.f32 %v1881_v58, %v754_v0  ;;  %875 = vrot.lane.b32.xlu1 %v2206_v63, %s1994_s20  ;;  %877 = vrot.lane.b32.xlu0 %v2206_v63, %s1995_s24 }
 0x14e   : > { %762 = vrot.lane.b32.xlu2 %v2206_v63, %s1996_s14 }
 0x14f   : > { %v758_v3 = vpack.c.bf16 %v755_v1, %v755_v1 }
 0x151   : > { %v785_v4 = vunpack.c.l.b16 %v758_v3 }
 0x153   : > { %v2211_v6 = vpack.c.b16 %v785_v4, %v785_v4 }
 0x155   : > { %1010 = vrot.lane.b32.xlu1 %v2211_v6, %s1997_s26  ;;  %1012 = vrot.lane.b32.xlu0 %v2211_v6, %s1998_s15 }
 0x156   : > { %787 = vrot.lane.b32.xlu2 %v2211_v6, %s1996_s14  ;;  %s2007_s14 = smov 24  }
 0x15d   : > { %1099 = vrot.lane.b32.xlu1 %v2206_v63, %s1999_s28  ;;  %1101 = vrot.lane.b32.xlu0 %v2206_v63, %s2000_s29 }
 0x15e   : > { %900 = vrot.lane.b32.xlu2 %v2211_v6, %s1995_s24  ;;  %s2006_s24 = smov 16  }
 0x165   : > { %1122 = vrot.lane.b32.xlu0 %v2211_v6, %s1999_s28  ;;  %s2430_s28 = scalar_lea.vmem %s2406_s6, %s2103_s30 }
 0x166   : > { %898 = vrot.lane.b32.xlu2 %v2211_v6, %s1994_s20  ;;  %s2005_s20 = smov 8  }
 0x16d   : > { %832 = vrot.lane.b32.xlu0 %v2206_v63, %s2001_s13 }
 0x16e   : > { %989 = vrot.lane.b32.xlu2 %v2206_v63, %s1998_s15 }
 0x176   : > { %987 = vrot.lane.b32.xlu2 %v2206_v63, %s1997_s26 }
 0x17e   : > { %1124 = vrot.lane.b32.xlu2 %v2211_v6, %s2000_s29 }
 0x1a8   : > { %v763_v7 = vpop.permute.xlu2 %762 }
 0x1a9   : > { %v769_v8 = vsel %vm764_vm9, %v763_v7, 0 }
 0x1aa   : > { %778 = vmatpush.bf16.xpose.msra.mxu1 %v769_v8 }
 0x1b0   : > { %v788_v9 = vpop.permute.xlu2 %787 }
 0x1b1   : > { %1726 = vmatmul.msk.bf16.vlgmr.msra.gmra.mxu1 %vm764_vm9, %v757_v61  ;;  %v793_v10 = vsel %vm764_vm9, %v788_v9, 0 }
 0x1b2   : > { %802 = vmatpush.bf16.xpose.msra.mxu2 %v793_v10 }
 0x1b8   : > { %v901_v11 = vpop.permute.xlu2 %900 }
 0x1b9   : > { %1727 = vmatmul.msk.bf16.vlgmr.msra.gmra.mxu2 %vm764_vm9, %v758_v3  ;;  %v906_v12 = vsel %vm764_vm9, %v901_v11, 0 }
 0x1ba   : > { %915 = vmatpush.bf16.xpose.msrb.mxu1 %v906_v12 }
 0x1bf   : > { %v878_v13 = vpop.permute.xlu0 %877  ;;  %v876_v17 = vpop.permute.xlu1 %875 }
 0x1c0   : > { %v899_v14 = vpop.permute.xlu2 %898  ;;  %v883_v15 = vsel %vm764_vm9, %v878_v13, 0 }
 0x1c1   : > { %1731 = vmatmul.msk.bf16.vlgmr.msrb.gmra.mxu1 %vm764_vm9, %v899_v14  ;;  %892 = vmatpush.bf16.xpose.msrb.mxu0 %v883_v15 }
 0x1c7   : > { %v1013_v18 = vpop.permute.xlu0 %1012  ;;  %v1011_v23 = vpop.permute.xlu1 %1010 }
 0x1c8   : > { %v1018_v19 = vsel %vm764_vm9, %v1013_v18, 0  ;;  %v990_v20 = vpop.permute.xlu2 %989  ;;  %1730 = vmatmul.msk.bf16.vlgmr.msrb.gmra.mxu0 %vm764_vm9, %v876_v17 }
 0x1c9   : > { %v995_v21 = vsel %vm764_vm9, %v990_v20, 0  ;;  %1027 = vmatpush.bf16.xpose.msra.mxu1 %v1018_v19 }
 0x1ca   : > { %1004 = vmatpush.bf16.xpose.msra.mxu0 %v995_v21 }
 0x1cf   : > { %v1102_v22 = vpop.permute.xlu0 %1101  ;;  %v1100_v31 = vpop.permute.xlu1 %1099 }
 0x1d0   : > { %v1107_v24 = vsel %vm764_vm9, %v1102_v22, 0  ;;  %v988_v25 = vpop.permute.xlu2 %987 }
 0x1d1   : > { %1735 = vmatmul.msk.bf16.vlgmr.msra.gmra.mxu1 %vm764_vm9, %v1011_v23 }
 0x1d2   : > { %1116 = vmatpush.bf16.xpose.msrb.mxu0 %v1107_v24 }
 0x1d7   : > { %v1123_v26 = vpop.permute.xlu0 %1122 }
 0x1d8   : > { %v1125_v27 = vpop.permute.xlu2 %1124  ;;  %1734 = vmatmul.msk.bf16.vlgmr.msra.gmra.mxu0 %vm764_vm9, %v988_v25 }
 0x1d9   : > { %v1130_v28 = vsel %vm764_vm9, %v1125_v27, 0 }
 0x1da   : > { %1139 = vmatpush.bf16.xpose.msrb.mxu1 %v1130_v28 }
 0x1df   : > { %v833_v29 = vpop.permute.xlu0 %832 }
 0x1e0   : > { %v839_v30 = vsel %vm837_vm10, %v833_v29, 0 }
 0x1e1   : > { %1739 = vmatmul.msk.bf16.vlgmr.msrb.gmra.mxu1 %vm764_vm9, %v1123_v26  ;;  %848 = vmatpush.bf16.msra.mxu3 %v839_v30 }
 0x1e8   : > { %1738 = vmatmul.msk.bf16.vlgmr.msrb.gmra.mxu0 %vm764_vm9, %v1100_v31 }
 0x22e   : > { %v780_v32 = vpop.f32.mrf.mxu1 }
 0x22f   : > { %v808_v33 = vsel %vm764_vm9, %v780_v32, -inf }
 0x230   : > { %809 = vmax.xlane.f32.xlu2 %v808_v33 }
 0x236   : > { %v782_v34 = vpop.f32.mrf.mxu1 }
 0x23c   : > { %v804_v35 = vpop.f32.mrf.mxu2 }
 0x23d   : > { %v811_v36 = vsel %vm764_vm9, %v804_v35, -inf }
 0x23e   : > { %812 = vmax.xlane.f32.xlu1 %v811_v36  ;;  %v2245_v37 = vpop.f32.mrf.mxu1 }
 0x23f   : > { %v924_v38 = vsel %vm764_vm9, %v2245_v37, -inf }
 0x240   : > { %925 = vmax.xlane.f32.xlu2 %v924_v38 }
 0x244   : > { %v806_v39 = vpop.f32.mrf.mxu2 }
 0x245   : > { %v894_v40 = vpop.f32.mrf.mxu0 }
 0x246   : > { %v919_v41 = vpop.f32.mrf.mxu1  ;;  %v921_v42 = vsel %vm764_vm9, %v894_v40, -inf }
 0x247   : > { %922 = vmax.xlane.f32.xlu0 %v921_v42 }
 0x24d   : > { %v896_v43 = vpop.f32.mrf.mxu0 }
 0x24e   : > { %v2250_v44 = vpop.f32.mrf.mxu1 }
 0x24f   : > { %v1036_v45 = vsel %vm764_vm9, %v2250_v44, -inf }
 0x250   : > { %1037 = vmax.xlane.f32.xlu1 %v1036_v45 }
 0x255   : > { %v1006_v46 = vpop.f32.mrf.mxu0 }
 0x256   : > { %v1031_v47 = vpop.f32.mrf.mxu1  ;;  %v1033_v48 = vsel %vm764_vm9, %v1006_v46, -inf }
 0x257   : > { %1034 = vmax.xlane.f32.xlu2 %v1033_v48 }
 0x25d   : > { %v1008_v49 = vpop.f32.mrf.mxu0 }
 0x25e   : > { %v2255_v50 = vpop.f32.mrf.mxu1 }
 0x25f   : > { %v1148_v51 = vsel %vm764_vm9, %v2255_v50, -inf }
 0x260   : > { %1149 = vmax.xlane.f32.xlu0 %v1148_v51 }
 0x265   : > { %v1118_v52 = vpop.f32.mrf.mxu0 }
 0x266   : > { %v1143_v53 = vpop.f32.mrf.mxu1  ;;  %v1145_v54 = vsel %vm764_vm9, %v1118_v52, -inf }
 0x267   : > { %1146 = vmax.xlane.f32.xlu2 %v1145_v54 }
 0x26d   : > { %v1120_v55 = vpop.f32.mrf.mxu0 }
 0x274   : > { %1057 = vrot.lane.b32.xlu0 %v2206_v63, %s2002_s16 }
 0x27f   : > { %945 = vrot.lane.b32.xlu2 %v2206_v63, %s2003_s19 }
 0x2a3   : > { %v810_v56 = vpop.xlane.xlu2 %809 }
 0x2a4   : > { %v814_v57 = vsub.f32 %v780_v32, %v810_v56 }
 0x2a6   : > { %v816_v58 = vmul.f32 1.442695, %v814_v57 }
 0x2a8   : > { %1893 = vpow2.f32 %v816_v58 }
 0x2ae   : > { %v1894_v59 = vpop.eup %1893 }
 0x2af   : > { %v820_v60 = vsel %vm764_vm9, %v1894_v59, 0.0 }
 0x2b0   : > { %821 = vadd.xlane.f32.xlu1 %v820_v60 }
 0x2b1   : > { %v813_v61 = vpop.xlane.xlu1 %812 }
 0x2b2   : > { %v815_v1 = vsub.f32 %v804_v35, %v813_v61 }
 0x2b3   : > { %v926_v7 = vpop.xlane.xlu2 %925 }
 0x2b4   : > { %v818_v4 = vmul.f32 1.442695, %v815_v1  ;;  %v928_v22 = vsub.f32 %v2245_v37, %v926_v7 }
 0x2b6   : > { %v931_v24 = vmul.f32 1.442695, %v928_v22 }
 0x2ba   : > { %v923_v62 = vpop.xlane.xlu0 %922 }
 0x2bb   : > { %v927_v0 = vsub.f32 %v894_v40, %v923_v62 }
 0x2bd   : > { %v929_v3 = vmul.f32 1.442695, %v927_v0 }
 0x2bf   : > { %1895 = vpow2.f32 %v929_v3 }
 0x2c0   : > { %1897 = vpow2.f32 %v818_v4 }
 0x2c3   : > { %v1038_v30 = vpop.xlane.xlu1 %1037 }
 0x2c4   : > { %v1040_v31 = vsub.f32 %v2250_v44, %v1038_v30 }
 0x2c5   : > { %v2265_v8 = vpop.eup %1895 }
 0x2c6   : > { %v933_v9 = vsel %vm764_vm9, %v2265_v8, 0.0  ;;  %v1898_v11 = vpop.eup %1897  ;;  %v1043_v32 = vmul.f32 1.442695, %v1040_v31 }
 0x2c7   : > { %934 = vadd.xlane.f32.xlu2 %v933_v9  ;;  %v823_v14 = vsel %vm764_vm9, %v1898_v11, 0.0 }
 0x2c9   : > { %854 = vrot.lane.b32.xlu1 %v2211_v6, %s2001_s13 }
 0x2ca   : > { %v1035_v10 = vpop.xlane.xlu2 %1034 }
 0x2cb   : > { %v1039_v12 = vsub.f32 %v1006_v46, %v1035_v10 }
 0x2cd   : > { %v1041_v13 = vmul.f32 1.442695, %v1039_v12 }
 0x2cf   : > { %1899 = vpow2.f32 %v1041_v13  ;;  %824 = vadd.xlane.f32.xlu2 %v823_v14 }
 0x2d3   : > { %v1150_v21 = vpop.xlane.xlu0 %1149 }
 0x2d4   : > { %v1152_v36 = vsub.f32 %v2255_v50, %v1150_v21 }
 0x2d5   : > { %v2272_v15 = vpop.eup %1899 }
 0x2d6   : > { %v1045_v17 = vsel %vm764_vm9, %v2272_v15, 0.0  ;;  %v1155_v37 = vmul.f32 1.442695, %v1152_v36 }
 0x2d7   : > { %1046 = vadd.xlane.f32.xlu0 %v1045_v17 }
 0x2da   : > { %v1147_v18 = vpop.xlane.xlu2 %1146 }
 0x2db   : > { %v1151_v19 = vsub.f32 %v1118_v52, %v1147_v18 }
 0x2dd   : > { %v1153_v20 = vmul.f32 1.442695, %v1151_v19 }
 0x2df   : > { %1901 = vpow2.f32 %v1153_v20 }
 0x2e0   : > { %1903 = vpow2.f32 %v931_v24 }
 0x2e1   : > { %1905 = vpow2.f32 %v1043_v32 }
 0x2e2   : > { %v946_v42 = vpop.permute.xlu2 %945 }
 0x2e3   : > { %v951_v46 = vsel %vm837_vm10, %v946_v42, 0  ;;  %v1805_v42 = vld [vmem:[%s2429_s22] sm:$0xff] }
 0x2e5   : > { %v2277_v23 = vpop.eup %1901 }
 0x2e6   : > { %v1058_v25 = vpop.permute.xlu0 %1057  ;;  %v1157_v26 = vsel %vm764_vm9, %v2277_v23, 0.0  ;;  %v1904_v28 = vpop.eup %1903 }
 0x2e7   : > { %966 = vrot.lane.b32.xlu2 %v2211_v6, %s2003_s19  ;;  %v1063_v27 = vsel %vm837_vm10, %v1058_v25, 0  ;;  %1158 = vadd.xlane.f32.xlu0 %v1157_v26  ;;  %v936_v29 = vsel %vm764_vm9, %v1904_v28, 0.0  ;;  %v2287_v33 = vpop.eup %1905 }
 0x2e8   : > { %1072 = vmatpush.bf16.msrb.mxu2 %v1063_v27  ;;  %v1048_v34 = vsel %vm764_vm9, %v2287_v33, 0.0 }
 0x2f3   : > { %937 = vadd.xlane.f32.xlu1 %v936_v29 }
 0x2fb   : > { %1190 = vrot.lane.b32.xlu0 %v2211_v6, %s2004_s18 }
 0x30c   : > { %1078 = vrot.lane.b32.xlu1 %v2211_v6, %s2002_s16 }
 0x310   : > { %1049 = vadd.xlane.f32.xlu2 %v1048_v34 }
 0x323   : > { %v822_v35 = vpop.xlane.xlu1 %821 }
 0x324   : > { %1907 = vrcp.f32 %v822_v35 }
 0x325   : > { %1909 = vpow2.f32 %v1155_v37 }
 0x328   : > { %1169 = vrot.lane.b32.xlu2 %v2206_v63, %s2004_s18 }
 0x32a   : > { %v1908_v38 = vpop.eup %1907 }
 0x32b   : > { %v828_v39 = vmul.f32 %v1908_v38, %v1894_v59  ;;  %v1910_v41 = vpop.eup %1909 }
 0x32c   : > { %v1160_v6 = vsel %vm764_vm9, %v1910_v41, 0.0 }
 0x32d   : > { %v830_v40 = vpack.c.bf16 %v828_v39, %v828_v39 }
 0x32f   : > { %1728 = vmatmul.msk.bf16.vlgmr.msra.gmra.mxu3 %vm764_vm9, %v830_v40 }
 0x336   : > { %1161 = vadd.xlane.f32.xlu1 %v1160_v6 }
 0x33a   : > { %v935_v43 = vpop.xlane.xlu2 %934 }
 0x33b   : > { %v855_v44 = vpop.permute.xlu1 %854 }
 0x33c   : > { %v860_v45 = vsel %vm837_vm10, %v855_v44, 0 }
 0x33d   : > { %869 = vmatpush.bf16.msrb.mxu3 %v860_v45 }
 0x341   : > { %960 = vmatpush.bf16.msra.mxu3 %v951_v46 }
 0x342   : > { %v825_v63 = vpop.xlane.xlu2 %824 }
 0x343   : > { %1911 = vrcp.f32 %v825_v63 }
 0x349   : > { %v1912_v47 = vpop.eup %1911 }
 0x34a   : > { %v829_v48 = vmul.f32 %v1912_v47, %v1898_v11  ;;  %v1047_v49 = vpop.xlane.xlu0 %1046  ;;  %v967_v50 = vpop.permute.xlu2 %966 }
 0x34b   : > { %1913 = vrcp.f32 %v1047_v49  ;;  %v972_v52 = vsel %vm837_vm10, %v967_v50, 0 }
 0x34c   : > { %v831_v51 = vpack.c.bf16 %v829_v48, %v829_v48  ;;  %1915 = vrcp.f32 %v935_v43 }
 0x34e   : > { %1729 = vmatmul.msk.bf16.vlgmr.msrb.gmra.mxu3 %vm764_vm9, %v831_v51 }
 0x34f   : > { %981 = vmatpush.bf16.msrb.mxu3 %v972_v52 }
 0x351   : > { %v1914_v53 = vpop.eup %1913 }
 0x352   : > { %v1053_v54 = vmul.f32 %v1914_v53, %v2272_v15  ;;  %v1916_v56 = vpop.eup %1915 }
 0x353   : > { %v941_v57 = vmul.f32 %v1916_v56, %v2265_v8 }
 0x354   : > { %v1055_v55 = vpack.c.bf16 %v1053_v54, %v1053_v54 }
 0x355   : > { %v943_v58 = vpack.c.bf16 %v941_v57, %v941_v57  ;;  %v1882_v57 = vld [vmem:[%s2430_s28] ss:$0 sm:$0xff] }
 0x356   : > { %1736 = vmatmul.msk.bf16.vlgmr.msrb.gmra.mxu2 %vm764_vm9, %v1055_v55 }
 0x35a   : > { %v1159_v0 = vpop.xlane.xlu0 %1158 }
 0x35e   : > { %1732 = vmatmul.msk.bf16.vlgmr.msra.gmra.mxu3 %vm764_vm9, %v943_v58 }
 0x366   : > { %v938_v59 = vpop.xlane.xlu1 %937 }
 0x367   : > { %1917 = vrcp.f32 %v938_v59 }
 0x368   : > { %1919 = vrcp.f32 %v1159_v0 }
 0x36d   : > { %v1918_v60 = vpop.eup %1917  ;;  %v1191_v1 = vpop.permute.xlu0 %1190 }
 0x36e   : > { %v942_v61 = vmul.f32 %v1918_v60, %v1904_v28  ;;  %v1196_v7 = vsel %vm837_vm10, %v1191_v1, 0  ;;  %v1920_v9 = vpop.eup %1919 }
 0x36f   : > { %v1165_v11 = vmul.f32 %v1920_v9, %v2277_v23 }
 0x370   : > { %v944_v62 = vpack.c.bf16 %v942_v61, %v942_v61 }
 0x371   : > { %v1167_v17 = vpack.c.bf16 %v1165_v11, %v1165_v11 }
 0x372   : > { %1733 = vmatmul.msk.bf16.vlgmr.msrb.gmra.mxu3 %vm764_vm9, %v944_v62 }
 0x37e   : > { %v1079_v3 = vpop.permute.xlu1 %1078 }
 0x37f   : > { %v1084_v4 = vsel %vm837_vm10, %v1079_v3, 0 }
 0x380   : > { %1093 = vmatpush.bf16.msra.mxu3 %v1084_v4 }
 0x383   : > { %v1050_v8 = vpop.xlane.xlu2 %1049 }
 0x384   : > { %1205 = vmatpush.bf16.msrb.mxu3 %v1196_v7  ;;  %1921 = vrcp.f32 %v1050_v8 }
 0x38a   : > { %v1922_v10 = vpop.eup %1921 }
 0x38b   : > { %v1054_v12 = vmul.f32 %v1922_v10, %v2287_v33  ;;  %v1170_v13 = vpop.permute.xlu2 %1169 }
 0x38c   : > { %v1175_v14 = vsel %vm837_vm10, %v1170_v13, 0 }
 0x38d   : > { %v1056_v15 = vpack.c.bf16 %v1054_v12, %v1054_v12  ;;  %1184 = vmatpush.bf16.msra.mxu2 %v1175_v14  ;;  %v1808_v12 = vld [vmem:[%s2143_s3 + $0x8] sm:$0xff] }
 0x38e   : > { %1373 = vmatpush.bf16.msra.mxu1 %v1808_v12 }
 0x38f   : > { %1737 = vmatmul.msk.bf16.vlgmr.msra.gmra.mxu3 %vm764_vm9, %v1056_v15  ;;  %v1807_v15 = vld [vmem:[%s2143_s3] sm:$0xff] }
 0x390   : > { %1740 = vmatmul.msk.bf16.vlgmr.msra.gmra.mxu2 %vm764_vm9, %v1167_v17 }
 0x392   : > { %1374 = vmatpush.bf16.msra.mxu1 %v1807_v15 }
 0x3a9   : > { %v1162_v18 = vpop.xlane.xlu1 %1161 }
 0x3aa   : > { %1923 = vrcp.f32 %v1162_v18 }
 0x3b0   : > { %v1924_v19 = vpop.eup %1923 }
 0x3b1   : > { %v1166_v20 = vmul.f32 %v1924_v19, %v1910_v41  ;;  %v1806_v41 = vld [vmem:[%s2429_s22 + $0x8] sm:$0xff] }
 0x3b2   : > { %v850_v21 = vpop.f32.mrf.mxu3  ;;  %1273 = vmatpush.bf16.msra.mxu0 %v1806_v41 }
 0x3b3   : > { %v1168_v22 = vpack.c.bf16 %v1166_v20, %v1166_v20 }
 0x3b5   : > { %1741 = vmatmul.msk.bf16.vlgmr.msrb.gmra.mxu3 %vm764_vm9, %v1168_v22 }
 0x3b6   : > { %1274 = vmatpush.bf16.msra.mxu0 %v1805_v42 }
 0x3ba   : > { %v852_v23 = vpop.f32.mrf.mxu3 }
 0x3d1   : > { %v871_v24 = vpop.f32.mrf.mxu3 }
 0x3d9   : > { %v873_v25 = vpop.f32.mrf.mxu3  ;;  %v1074_v26 = vpop.f32.mrf.mxu2 }
 0x3e1   : > { %v962_v27 = vpop.f32.mrf.mxu3  ;;  %v1076_v28 = vpop.f32.mrf.mxu2 }
 0x3e9   : > { %v964_v29 = vpop.f32.mrf.mxu3 }
 0x3f5   : > { %v983_v30 = vpop.f32.mrf.mxu3 }
 0x3f6   : > { %v1864_v31 = vpack.i.bf16 %v983_v30, %v962_v27 }
 0x3f8   : > { %1865 = vrot.lane.b32.xlu2 %v1864_v31, %s2005_s20 }
 0x3fd   : > { %v985_v32 = vpop.f32.mrf.mxu3 }
 0x412   : > { %v1095_v33 = vpop.f32.mrf.mxu3 }
 0x413   : > { %v1869_v34 = vpack.i.bf16 %v1095_v33, %v1074_v26  ;;  %v1186_v35 = vpop.f32.mrf.mxu2 }
 0x415   : > { %1870 = vrot.lane.b32.xlu2 %v1869_v34, %s2006_s24 }
 0x41a   : > { %v1097_v36 = vpop.f32.mrf.mxu3 }
 0x41b   : > { %v1188_v37 = vpop.f32.mrf.mxu2 }
 0x41c   : > { %v1883_v37 = vld [vmem:[%s618_s27] ss:$0 sm:$0xff] }
 0x438   : > { %v1207_v38 = vpop.f32.mrf.mxu3 }
 0x439   : > { %v1874_v39 = vpack.i.bf16 %v1207_v38, %v1186_v35 }
 0x43b   : > { %1875 = vrot.lane.b32.xlu1 %v1874_v39, %s2007_s14 }
 0x440   : > { %v1209_v40 = vpop.f32.mrf.mxu3 }
 0x452   : > { %v1866_v6 = vpop.permute.xlu2 %1865 }
 0x453   : > { %v1868_v44 = vunpack.i.h.bf16 %v1866_v6  ;;  %v1867_v45 = vunpack.i.l.bf16 %v1866_v6 }
 0x455   : > { %v1236_v48 = vsel %vm764_vm9, %v871_v24, %v1868_v44  ;;  %v1235_v49 = vsel %vm764_vm9, %v850_v21, %v1867_v45 }
 0x46f   : > { %v1871_v43 = vpop.permute.xlu2 %1870 }
 0x470   : > { %v1873_v46 = vunpack.i.h.bf16 %v1871_v43  ;;  %v1872_v63 = vunpack.i.l.bf16 %v1871_v43  ;;  %v1884_v43 = vld [vmem:[%s621_s23] ss:$0 sm:$0xff] }
 0x472   : > { %v1238_v52 = vsel %vm1237_vm11, %v1235_v49, %v1872_v63  ;;  %v1239_v53 = vsel %vm1237_vm11, %v1236_v48, %v1873_v46  ;;  %v1815_v48 = vld [vmem:[%s2153_s17 + $0x30] sm:$0xff]  ;;  %v1814_v49 = vld [vmem:[%s2153_s17 + $0x28] sm:$0xff] }
 0x4ad   : > { %v1876_v47 = vpop.permute.xlu1 %1875 }
 0x4ae   : > { %v1878_v50 = vunpack.i.h.bf16 %v1876_v47  ;;  %v1877_v51 = vunpack.i.l.bf16 %v1876_v47  ;;  %v1816_v47 = vld [vmem:[%s2153_s17 + $0x38] sm:$0xff] }
 0x4af   : > { %1492 = vmatpush.bf16.msrb.mxu2 %v1816_v47 }
 0x4b0   : > { %v1241_v54 = vsel %vm1240_vm12, %v1238_v52, %v1877_v51  ;;  %v1242_v55 = vsel %vm1240_vm12, %v1239_v53, %v1878_v50  ;;  %v1813_v50 = vld [vmem:[%s2153_s17 + $0x20] sm:$0xff]  ;;  %v1812_v51 = vld [vmem:[%s2153_s17 + $0x18] sm:$0xff] }
 0x4b1   : > { %v1243_v56 = vpack.c.bf16 %v1242_v55, %v1241_v54  ;;  %v1885_v52 = vld [vmem:[%s629_s5] ss:$0 sm:$0xff]  ;;  %v1811_v54 = vld [vmem:[%s2153_s17 + $0x10] sm:$0xff] }
 0x4b3   : > { %1750 = vmatmul.msk.bf16.vlgmr.msra.gmra.mxu0 %vm653_vm1, %v1243_v56  ;;  %1493 = vmatpush.bf16.msrb.mxu2 %v1815_v48 }
 0x4b7   : > { %1494 = vmatpush.bf16.msrb.mxu2 %v1814_v49 }
 0x4bb   : > { %1495 = vmatpush.bf16.msrb.mxu2 %v1813_v50 }
 0x4bf   : > { %1496 = vmatpush.bf16.msrb.mxu2 %v1812_v51 }
 0x4c3   : > { %1497 = vmatpush.bf16.msrb.mxu2 %v1811_v54 }
 0x530   : > { %v1276_v58 = vpop.f32.mrf.mxu0 }
 0x531   : > { %v1277_v59 = vadd.f32 %v1882_v57, %v1276_v58 }
 0x533   : > { %v2326_v60 = vadd.f32 %v1277_v59, %v2166_v2 }
 0x535   : > { %v1285_v61 = vsel %vm653_vm1, %v2326_v60, 0.0  ;;  %v1293_v62 = vmul.f32 %v2326_v60, %v2326_v60 }
 0x536   : > { %1286 = vadd.xlane.f32.xlu2 %v1285_v61  ;;  %v1809_v61 = vld [vmem:[%s2153_s17] sm:$0xff] }
 0x537   : > { %v1295_v0 = vsel %vm653_vm1, %v1293_v62, 0.0 }
 0x538   : > { %v1278_v1 = vpop.f32.mrf.mxu0  ;;  %1296 = vadd.xlane.f32.xlu1 %v1295_v0 }
 0x539   : > { %v1279_v3 = vadd.f32 %v1882_v57, %v1278_v1  ;;  %v1810_v57 = vld [vmem:[%s2153_s17 + $0x8] sm:$0xff] }
 0x53a   : > { %1498 = vmatpush.bf16.msrb.mxu2 %v1810_v57 }
 0x53b   : > { %v2334_v4 = vadd.f32 %v1279_v3, %v2172_v5 }
 0x53d   : > { %v1288_v2 = vsel %vm653_vm1, %v2334_v4, 0.0  ;;  %v1294_v7 = vmul.f32 %v2334_v4, %v2334_v4 }
 0x53e   : > { %1289 = vadd.xlane.f32.xlu0 %v1288_v2  ;;  %1499 = vmatpush.bf16.msrb.mxu2 %v1809_v61 }
 0x53f   : > { %v1298_v8 = vsel %vm653_vm1, %v1294_v7, 0.0 }
 0x540   : > { %1299 = vadd.xlane.f32.xlu2 %v1298_v8 }
 0x5a9   : > { %v1287_v9 = vpop.xlane.xlu2 %1286 }
 0x5aa   : > { %v1291_v10 = vmul.f32 %v1287_v9, %v2180_v16 }
 0x5ab   : > { %v1297_v11 = vpop.xlane.xlu1 %1296 }
 0x5ac   : > { %v1303_v13 = vmul.f32 %v1291_v10, %v1291_v10  ;;  %v1301_v14 = vmul.f32 %v1297_v11, %v2180_v16 }
 0x5ae   : > { %v1305_v5 = vsub.f32 %v1301_v14, %v1303_v13 }
 0x5b0   : > { %v1309_v17 = vadd.f32 1e-05, %v1305_v5 }
 0x5b1   : > { %v1290_v18 = vpop.xlane.xlu0 %1289 }
 0x5b2   : > { %1925 = vrsqrt.f32 %v1309_v17  ;;  %v1292_v19 = vmul.f32 %v1290_v18, %v2180_v16  ;;  %vm1317_vm14 = vweird.f32 %v1309_v17 }
 0x5b3   : > { %v1300_v20 = vpop.xlane.xlu2 %1299 }
 0x5b4   : > { %v1304_v21 = vmul.f32 %v1292_v19, %v1292_v19  ;;  %v1302_v22 = vmul.f32 %v1300_v20, %v2180_v16  ;;  %v1307_v16 = vsub.f32 %v2326_v60, %v1291_v10  ;;  %v1308_v40 = vsub.f32 %v2334_v4, %v1292_v19 }
 0x5b6   : > { %v1306_v23 = vsub.f32 %v1302_v22, %v1304_v21 }
 0x5b8   : > { %v1926_v24 = vpop.eup %1925  ;;  %v1310_v25 = vadd.f32 1e-05, %v1306_v23 }
 0x5b9   : > { %v1312_v26 = vmul.f32 %v1926_v24, %v1309_v17  ;;  %vm1318_vm13 = vweird.f32 %v1926_v24 }
 0x5ba   : > { %1927 = vrsqrt.f32 %v1310_v25  ;;  %vm1319_vm15 = vmor %vm1317_vm14, %vm1318_vm13  ;;  %vm1327_vm2 = vweird.f32 %v1310_v25 }
 0x5bb   : > { %v1313_v27 = vmul.f32 %v1926_v24, %v1312_v26 }
 0x5bd   : > { %v1314_v28 = vmul.f32 0.5, %v1313_v27 }
 0x5bf   : > { %v1315_v29 = vsub.f32 1.5, %v1314_v28 }
 0x5c0   : > { %v1928_v30 = vpop.eup %1927 }
 0x5c1   : > { %v1316_v31 = vmul.f32 %v1926_v24, %v1315_v29  ;;  %v1322_v32 = vmul.f32 %v1928_v30, %v1310_v25  ;;  %vm1328_vm0 = vweird.f32 %v1928_v30 }
 0x5c2   : > { %vm1329_vm3 = vmor %vm1327_vm2, %vm1328_vm0 }
 0x5c3   : > { %v1323_v33 = vmul.f32 %v1928_v30, %v1322_v32  ;;  %v1320_v34 = vsel %vm1319_vm15, %v1926_v24, %v1316_v31  ;;  %v1886_v32 = vld [vmem:[%s637_s21] ss:$0 sm:$0xff] }
 0x5c4   : > { %v1331_v38 = vmul.f32 %v1320_v34, %v1307_v16 }
 0x5c5   : > { %v1324_v35 = vmul.f32 0.5, %v1323_v33 }
 0x5c6   : > { %v1336_v42 = vmul.f32 %v1883_v37, %v1331_v38 }
 0x5c7   : > { %v1325_v36 = vsub.f32 1.5, %v1324_v35 }
 0x5c8   : > { %v1341_v45 = vadd.f32 %v1884_v43, %v1336_v42 }
 0x5c9   : > { %v1326_v39 = vmul.f32 %v1928_v30, %v1325_v36 }
 0x5cb   : > { %v1330_v41 = vsel %vm1329_vm3, %v1928_v30, %v1326_v39 }
 0x5cc   : > { %v1332_v6 = vmul.f32 %v1330_v41, %v1308_v40 }
 0x5ce   : > { %v1337_v44 = vmul.f32 %v1883_v37, %v1332_v6 }
 0x5d0   : > { %v1342_v46 = vadd.f32 %v1884_v43, %v1337_v44 }
 0x5d2   : > { %v1343_v63 = vpack.c.bf16 %v1342_v46, %v1341_v45 }
 0x5d4   : > { %1759 = vmatmul.msk.bf16.vlgmr.msra.gmra.mxu1 %vm653_vm1, %v1343_v63 }
 0x651   : > { %v1376_v53 = vpop.f32.mrf.mxu1 }
 0x652   : > { %v1377_v55 = vadd.f32 %v1885_v52, %v1376_v53 }
 0x654   : > { %v1760_v56 = vmul.f32 -1.702, %v1377_v55 }
 0x656   : > { %v1385_v58 = vmul.f32 1.442695, %v1760_v56 }
 0x658   : > { %1929 = vpow2.f32 %v1385_v58 }
 0x659   : > { %v1378_v59 = vpop.f32.mrf.mxu1 }
 0x65a   : > { %v1379_v62 = vadd.f32 %v1885_v52, %v1378_v59 }
 0x65c   : > { %v1761_v0 = vmul.f32 -1.702, %v1379_v62 }
 0x65e   : > { %v1930_v1 = vpop.eup %1929  ;;  %v1387_v3 = vmul.f32 1.442695, %v1761_v0 }
 0x65f   : > { %v1389_v2 = vadd.f32 1.0, %v1930_v1 }
 0x660   : > { %1931 = vpow2.f32 %v1387_v3 }
 0x661   : > { %1933 = vrcp.f32 %v1389_v2  ;;  %v1402_v15 = vand.u32 2147483648, %v1389_v2  ;;  %vm1396_vm5 = vweird.f32 %v1389_v2  ;;  %v1400_v17 = vand.u32 2147483647, %v1389_v2 }
 0x663   : > { %v1403_v23 = vor.u32 1.1754944e-38, %v1402_v15  ;;  %vm1401_vm8 = vcmp.eq.f32.partialorder %v1400_v17, 8.507059e+37 }
 0x666   : > { %v1932_v7 = vpop.eup %1931 }
 0x667   : > { %v1934_v8 = vpop.eup %1933  ;;  %v1390_v9 = vadd.f32 1.0, %v1932_v7 }
 0x668   : > { %v1392_v10 = vmul.f32 %v1934_v8, %v1389_v2  ;;  %vm1397_vm4 = vweird.f32 %v1934_v8 }
 0x669   : > { %1935 = vrcp.f32 %v1390_v9  ;;  %vm1398_vm6 = vmor %vm1396_vm5, %vm1397_vm4  ;;  %v1417_v19 = vand.u32 2147483648, %v1390_v9  ;;  %v1415_v22 = vand.u32 2147483647, %v1390_v9  ;;  %vm1411_vm9 = vweird.f32 %v1390_v9 }
 0x66a   : > { %v1393_v11 = vsub.f32 1.0, %v1392_v10 }
 0x66b   : > { %v1418_v26 = vor.u32 1.1754944e-38, %v1417_v19  ;;  %vm1416_vm11 = vcmp.eq.f32.partialorder %v1415_v22, 8.507059e+37 }
 0x66c   : > { %v1394_v12 = vmul.f32 %v1934_v8, %v1393_v11 }
 0x66e   : > { %v1395_v14 = vadd.f32 %v1934_v8, %v1394_v12 }
 0x66f   : > { %v1936_v13 = vpop.eup %1935 }
 0x670   : > { %v1407_v5 = vmul.f32 %v1936_v13, %v1390_v9  ;;  %v1399_v20 = vsel %vm1398_vm6, %v1934_v8, %v1395_v14  ;;  %vm1412_vm7 = vweird.f32 %v1936_v13 }
 0x671   : > { %v1404_v25 = vsel %vm1401_vm8, %v1403_v23, %v1399_v20  ;;  %vm1413_vm10 = vmor %vm1411_vm9, %vm1412_vm7 }
 0x672   : > { %v1408_v18 = vsub.f32 1.0, %v1407_v5  ;;  %v1421_v29 = vmul.f32 %v1404_v25, %v1377_v55 }
 0x674   : > { %v1409_v21 = vmul.f32 %v1936_v13, %v1408_v18 }
 0x676   : > { %v1410_v24 = vadd.f32 %v1936_v13, %v1409_v21 }
 0x678   : > { %v1414_v27 = vsel %vm1413_vm10, %v1936_v13, %v1410_v24 }
 0x679   : > { %v1419_v28 = vsel %vm1416_vm11, %v1418_v26, %v1414_v27 }
 0x67a   : > { %v1422_v30 = vmul.f32 %v1419_v28, %v1379_v62 }
 0x67c   : > { %v1423_v31 = vpack.c.bf16 %v1422_v30, %v1421_v29 }
 0x67e   : > { %1500 = vmatmul.bf16.vlgmr.msrb.gmra.mxu2 %v1423_v31 }
 0x701   : > { %v1501_v33 = vpop.f32.mrf.mxu2 }
 0x702   : > { %v1502_v34 = vadd.f32 %v1886_v32, %v1501_v33 }
 0x704   : > { %v1506_v35 = vadd.f32 %v1502_v34, %v2326_v60 }
 0x706   : > { %1508 = vst.msk [vmem:[#allocation2] sm:$0xff] %vm653_vm1, %v1506_v35 }
 0x709   : > { %v1503_v16 = vpop.f32.mrf.mxu2 }
 0x70a   : > { %v1504_v36 = vadd.f32 %v1886_v32, %v1503_v16  ;;  %1513 = sbr.rel (%p1794_p6) target bundleno = 1809 (0x711), region = 80 }
 0x70c   : > { %v1507_v37 = vadd.f32 %v1504_v36, %v2334_v4 }
 0x70e   : > { %1509 = vst.msk [vmem:[#allocation2 + $0x8] sm:$0xff] %vm653_vm1, %v1507_v37 }
 0x70f   : > { %1514 = vst.msk [vmem:[#allocation3] sm:$0xff] %vm653_vm1, %v1506_v35 }
 0x710   : > { %1515 = vst.msk [vmem:[#allocation3 + $0x8] sm:$0xff] %vm653_vm1, %v1507_v37 }
 0x711 PF: > { %s2431_s30 = sld [smem:[#allocation7_spill]]  ;;  %s2008_s14 = smov [#allocation3]  }
 0x712   : > { %s2433_s22 = sld [smem:[#allocation12_spill]]  ;;  %s1524_s26 = sshll.u32 %s2008_s14, 4  ;;  %s1525_s26 = int_to_ptr.vmem [resolvable:$true] %s1524_s26 }
 0x713   : > { %s2009_s15 = smov 128  }
 0x717   : > { %s2432_s21 = sadd.s32 4294967295, %s2431_s30  }
 0x718   : > { %p1821_p7 = scmp.eq.s32.totalorder %s2432_s21, 1  ;;  %s1526_s24 = sshll.u32 %s2433_s22, 4  ;;  %s1527_s24 = int_to_ptr.hbm [resolvable:$true] %s1526_s24 }
 0x71a   : > { %1818 = dma.vmem_to_hbm [thread:$0]  (%p1821_p7), %s1525_s26, 256, %s1527_s24, [#allocation4], %s2009_s15, %s2009_s15, %s2005_s20  }
 0x71b   : > { %1978 = dma.done.wait (%p1821_p7), [#allocation4], 256  }
 0x71c   : > { %1980 = vsyncadd (%p1821_p7), [#allocation4], 4294967040 }
 0x71d PF: > { %s2434_s25 = sld [smem:[#allocation7_spill]] }
 0x71e   : > { %s2436_s26 = sld [smem:[#allocation8_spill]] }
 0x723   : > { %s24_s27 = sadd.s32 1, %s2434_s25   ;;  %s2435_s25 = sld [smem:[#allocation6_spill]] }
 0x724   : > { %p21_p8 = scmp.ge.s32.totalorder %s24_s27, 4  }
 0x726   :  { %23 = sbr.rel (!%p21_p8) target bundleno = 6 (0x6), region = 144 }
 0x72b   :  { %1543 = vsyncpa [#allocation4], 1 }
 0x72c   :  { %1545 = vsyncpa [#allocation4 + $0x1], 1 }

</bundles_post_ra>
